<compile_context>
chip_gen: v5e
topology: v5e:2x2
jax: 0.10.0
libtpu: 0.0.40
codegen_flags: <defaults>
</compile_context>

<pallas_src>
import numpy as np
import jax
import jax.numpy as jnp
from jax.experimental import pallas as pl
from jax.experimental.pallas import tpu as pltpu


def _bilstm_kernel(x_ref, len_ref, wih_ref, whh_ref, b_ref, out_ref):
    """Single invocation, everything resident in VMEM.

    x_ref   : (T*B, E)   float32, time-major rows (row t*B + b = x[b, t]).
    len_ref : (B, 1)     int32 sequence lengths.
    wih_ref : (E, 8H)    float32 fused input weights, gate-chunk order
                         [i_f, i_b, f_f, f_b, o_f, o_b, g_f, g_b].
    whh_ref : (2H, 8H)   float32 block-structured recurrent weights acting on the
                         concatenated state [h_f | h_b], same column order.
    b_ref   : (1, 8H)    float32 fused (b_ih + b_hh) biases, same column order.
    out_ref : (B, T*2H)  float32 lane-dense output; columns t*2H:(t+1)*2H hold
                         [h_f(t) | h_b(t)], zeroed past each sequence's length.
    """
    B = len_ref.shape[0]
    TB, _E = x_ref.shape
    T = TB // B
    H2 = whh_ref.shape[0]          # 2H  (concatenated state width)
    H = H2 // 2
    G = whh_ref.shape[1]           # 8H

    lens = len_ref[...]            # (B, 1) int32
    wih = wih_ref[...]             # (E, 8H)
    whh = whh_ref[...]             # (2H, 8H)
    bias = b_ref[...]              # (1, 8H)

    # ---- hoisted input projection for BOTH directions / ALL timesteps ----
    # one (T*B, E) @ (E, 8H) MXU call, bias folded in; off the serial chain.
    gx = jnp.dot(x_ref[...], wih, preferred_element_type=jnp.float32) + bias   # (T*B, 8H)

    # Lane masks, built once.
    gate_lane = jax.lax.broadcasted_iota(jnp.int32, (1, G), 1)
    is_fwd_col = (gate_lane % H2) < H          # fwd-direction gate columns of the 8H
    state_lane = jax.lax.broadcasted_iota(jnp.int32, (1, H2), 1)
    is_fwd_lane = state_lane < H               # fwd half of the (B, 2H) state

    # Per-step length masks precomputed off the recurrence chain:
    # lanes 0:H gate on (lens > t_fwd), lanes H:2H gate on (lens > t_bwd).
    masks = []
    for s in range(T):
        t_lane = jnp.where(is_fwd_lane, s, T - 1 - s)      # (1, 2H) int32
        masks.append(lens > t_lane)                        # (B, 2H) bool

    h = jnp.zeros((B, H2), jnp.float32)        # [h_fwd | h_bwd]
    c = jnp.zeros((B, H2), jnp.float32)        # [c_fwd | c_bwd]

    out_pieces = [None] * (2 * T)

    # Unrolled time loop (T is small & static).  fwd processes t=s, bwd t=T-1-s.
    # TODO(synk): for large T switch to lax.fori_loop(unroll=2..4) carrying (h, c)
    #             to bound vreg live ranges; full unroll is right for tiny static T.
    for s in range(T):
        tf = s
        tb = T - 1 - s

        # One fused recurrent matmul per serial step (fills 128 output lanes).
        # TODO(synk): on v5e/v6e, pltpu.matmul_push_rhs(whh) once before the loop
        #             + matmul_acc_lhs/matmul_pop per step would avoid re-pushing
        #             the same RHS every step; kept as jnp.dot for portability.
        gh = jnp.dot(h, whh, preferred_element_type=jnp.float32)       # (B, 8H)

        # x-side gates: fwd columns from time tf, bwd columns from time tb
        # (contiguous static row slabs thanks to the time-major layout).
        xg = jnp.where(is_fwd_col,
                       gx[tf * B:(tf + 1) * B, :],
                       gx[tb * B:(tb + 1) * B, :])                     # (B, 8H)
        gates = xg + gh

        # Grouped activations: one sigmoid over [i|f|o] (6H lanes), one tanh over g.
        sig = jax.nn.sigmoid(gates[:, 0:6 * H])                        # (B, 6H)
        g_in = jnp.tanh(gates[:, 6 * H:8 * H])                         # (B, 2H)
        i_g = sig[:, 0:2 * H]
        f_g = sig[:, 2 * H:4 * H]
        o_g = sig[:, 4 * H:6 * H]

        c_cand = f_g * c + i_g * g_in                                  # (B, 2H)
        h_cand = o_g * jnp.tanh(c_cand)                                # (B, 2H)

        # Packed-sequence semantics: past-length steps keep the old state;
        # pad_packed_sequence semantics: emitted outputs past length are zero.
        m = masks[s]
        h = jnp.where(m, h_cand, h)
        c = jnp.where(m, c_cand, c)

        out_m = jnp.where(m, h_cand, 0.0)
        out_pieces[2 * tf] = out_m[:, 0:H]             # fwd half belongs to time tf
        out_pieces[2 * tb + 1] = out_m[:, H:2 * H]     # bwd half belongs to time tb

    # Single lane-dense store of the whole padded output slab.
    out_ref[...] = jnp.concatenate(out_pieces, axis=-1)                # (B, T*2H)


def bilstm_forward(x_bte, lengths, params):
    """x_bte: (B, T, E) zero-padded, lengths: (B,) int.
    Returns (B, T, 2*H) float32, zero-padded beyond each length (batch_first)."""
    B, T, E = x_bte.shape
    H = params["whh_f"].shape[0]       # per-direction hidden (weights stored as (H, 4H))

    wih_f, wih_b = params["wih_f"], params["wih_b"]    # (E, 4H), columns [i|f|g|o]
    whh_f, whh_b = params["whh_f"], params["whh_b"]    # (H, 4H), columns [i|f|g|o]
    b_f, b_b = params["b_f"], params["b_b"]            # (1, 4H)

    sl_i, sl_f = slice(0, H), slice(H, 2 * H)
    sl_g, sl_o = slice(2 * H, 3 * H), slice(3 * H, 4 * H)

    def fuse_cols(mf, mb):
        # fused column order: [i_f, i_b, f_f, f_b, o_f, o_b, g_f, g_b]
        return jnp.concatenate(
            [mf[:, sl_i], mb[:, sl_i],
             mf[:, sl_f], mb[:, sl_f],
             mf[:, sl_o], mb[:, sl_o],
             mf[:, sl_g], mb[:, sl_g]], axis=1)

    wih_fused = fuse_cols(wih_f, wih_b)                # (E, 8H)
    b_fused = fuse_cols(b_f, b_b)                      # (1, 8H)

    # Block-structured recurrent weights on the concatenated state [h_f | h_b].
    whh_fused = jnp.zeros((2 * H, 8 * H), jnp.float32)
    whh_fused = whh_fused.at[0:H, 0 * H:1 * H].set(whh_f[:, sl_i])
    whh_fused = whh_fused.at[H:2 * H, 1 * H:2 * H].set(whh_b[:, sl_i])
    whh_fused = whh_fused.at[0:H, 2 * H:3 * H].set(whh_f[:, sl_f])
    whh_fused = whh_fused.at[H:2 * H, 3 * H:4 * H].set(whh_b[:, sl_f])
    whh_fused = whh_fused.at[0:H, 4 * H:5 * H].set(whh_f[:, sl_o])
    whh_fused = whh_fused.at[H:2 * H, 5 * H:6 * H].set(whh_b[:, sl_o])
    whh_fused = whh_fused.at[0:H, 6 * H:7 * H].set(whh_f[:, sl_g])
    whh_fused = whh_fused.at[H:2 * H, 7 * H:8 * H].set(whh_b[:, sl_g])

    # Time-major 2-D input so per-step reads in the kernel are contiguous rows.
    x_tm = jnp.transpose(x_bte, (1, 0, 2)).reshape(T * B, E)
    lens2d = lengths.astype(jnp.int32).reshape(B, 1)

    vmem = pl.BlockSpec(memory_space=pltpu.MemorySpace.VMEM)
    out_flat = pl.pallas_call(
        _bilstm_kernel,
        out_shape=jax.ShapeDtypeStruct((B, T * 2 * H), jnp.float32),
        in_specs=[vmem] * 5,
        out_specs=vmem,
    )(x_tm, lens2d, wih_fused, whh_fused, b_fused)

    # Lane-dense (B, T*2H) slab -> batch-first padded output (B, T, 2H).
    return out_flat.reshape(B, T, 2 * H)


def ref_bilstm(x, lengths, p):
    """Pure NumPy reference matching torch.nn.LSTM(bidirectional=True) +
    pad_packed_sequence(batch_first=True)."""
    B, T, E = x.shape
    H = p["whh_f"].shape[0]

    def sigmoid(z):
        return 1.0 / (1.0 + np.exp(-z))

    def cell(xv, h, c, wih, whh, bias):
        g = xv @ wih + h @ whh + bias[0]
        i = sigmoid(g[0:H]); f = sigmoid(g[H:2 * H])
        gg = np.tanh(g[2 * H:3 * H]); o = sigmoid(g[3 * H:4 * H])
        c = f * c + i * gg
        h = o * np.tanh(c)
        return h, c

    out = np.zeros((B, T, 2 * H), np.float32)
    for b in range(B):
        L = int(lengths[b])
        h = np.zeros(H, np.float32); c = np.zeros(H, np.float32)
        for t in range(L):
            h, c = cell(x[b, t], h, c, p["wih_f"], p["whh_f"], p["b_f"])
            out[b, t, :H] = h
        h = np.zeros(H, np.float32); c = np.zeros(H, np.float32)
        for t in range(L - 1, -1, -1):
            h, c = cell(x[b, t], h, c, p["wih_b"], p["whh_b"], p["b_b"])
            out[b, t, H:] = h
    return out


if __name__ == "__main__":
    # Small shapes consistent with the module: batch=4, max_seq=8,
    # embedding_dim=32, hidden_dim=32 (=> 16 per direction).
    B, T, E, HID = 4, 8, 32, 32
    H = HID // 2

    key = jax.random.PRNGKey(0)
    keys = jax.random.split(key, 10)

    def xavier_normal(k, shape, gain=0.5):
        # PyTorch xavier_normal_ on (out, in): std = gain*sqrt(2/(fan_in+fan_out))
        fan_out, fan_in = shape
        std = gain * np.sqrt(2.0 / (fan_in + fan_out))
        return std * jax.random.normal(k, shape, jnp.float32)

    def bias_init(k, n, h):
        bound = 1.0 / np.sqrt(h)
        return jax.random.uniform(k, (n,), jnp.float32, -bound, bound)

    # PyTorch stores weight_ih (4H, E) / weight_hh (4H, H); kernel uses transposes.
    wih_f = xavier_normal(keys[0], (4 * H, E)).T
    whh_f = xavier_normal(keys[1], (4 * H, H)).T
    b_f = (bias_init(keys[2], 4 * H, H) + bias_init(keys[3], 4 * H, H)).reshape(1, 4 * H)
    wih_b = xavier_normal(keys[4], (4 * H, E)).T
    whh_b = xavier_normal(keys[5], (4 * H, H)).T
    b_b = (bias_init(keys[6], 4 * H, H) + bias_init(keys[7], 4 * H, H)).reshape(1, 4 * H)

    params = dict(wih_f=wih_f, whh_f=whh_f, b_f=b_f,
                  wih_b=wih_b, whh_b=whh_b, b_b=b_b)

    # Variable-length input sequences, zero-padded (replaces pack_sequence).
    x = jax.random.normal(keys[8], (B, T, E), jnp.float32)
    lengths = jnp.array([8, 5, 7, 3], dtype=jnp.int32)
    pad_mask = (jnp.arange(T)[None, :] < lengths[:, None]).astype(jnp.float32)
    x = x * pad_mask[:, :, None]

    out = bilstm_forward(x, lengths, params)
    out = jax.block_until_ready(out)

    ref = ref_bilstm(np.asarray(x), np.asarray(lengths),
                     {k: np.asarray(v) for k, v in params.items()})
    np.testing.assert_allclose(np.asarray(out), ref, rtol=1e-3, atol=1e-3)

    print("KERNEL_OK")
</pallas_src>

<mosaic_0001>
module attributes {stable_mosaic.version = 11 : i64} {
  func.func @_bilstm_kernel(%arg0: memref<32x32xf32, #tpu.memory_space<vmem>>, %arg1: memref<4x1xi32, #tpu.memory_space<vmem>>, %arg2: memref<32x128xf32, #tpu.memory_space<vmem>>, %arg3: memref<32x128xf32, #tpu.memory_space<vmem>>, %arg4: memref<1x128xf32, #tpu.memory_space<vmem>>, %arg5: memref<4x256xf32, #tpu.memory_space<vmem>>) attributes {dimension_semantics = [], scalar_prefetch = 0 : i64, scratch_operands = 0 : i64, tpu.core_type = #tpu.core_type<tc>} {
    %c0 = arith.constant 0 : index
    %c0_0 = arith.constant 0 : index
    %0 = vector.load %arg1[%c0, %c0_0] : memref<4x1xi32, #tpu.memory_space<vmem>>, vector<4x1xi32>
    %c0_1 = arith.constant 0 : index
    %c0_2 = arith.constant 0 : index
    %1 = vector.load %arg2[%c0_1, %c0_2] : memref<32x128xf32, #tpu.memory_space<vmem>>, vector<32x128xf32>
    %c0_3 = arith.constant 0 : index
    %c0_4 = arith.constant 0 : index
    %2 = vector.load %arg3[%c0_3, %c0_4] : memref<32x128xf32, #tpu.memory_space<vmem>>, vector<32x128xf32>
    %c0_5 = arith.constant 0 : index
    %c0_6 = arith.constant 0 : index
    %3 = vector.load %arg4[%c0_5, %c0_6] : memref<1x128xf32, #tpu.memory_space<vmem>>, vector<1x128xf32>
    %c0_7 = arith.constant 0 : index
    %c0_8 = arith.constant 0 : index
    %4 = vector.load %arg0[%c0_7, %c0_8] : memref<32x32xf32, #tpu.memory_space<vmem>>, vector<32x32xf32>
    %cst = arith.constant dense<0.000000e+00> : vector<32x128xf32>
    %5 = tpu.matmul %4, %1, %cst {dimension_numbers = #tpu.dot_dimension_numbers<[1], [0], [0], [1], [0, 0, 1, 1], [], []>} : vector<32x32xf32>, vector<32x128xf32>, vector<32x128xf32> -> vector<32x128xf32>
    %6 = vector.broadcast %3 : vector<1x128xf32> to vector<32x128xf32>
    %7 = arith.addf %5, %6 : vector<32x128xf32>
    %8 = tpu.iota {dimensions = array<i32: 1>} : vector<1x128xi32>
    %c32_i32 = arith.constant 32 : i32
    %c0_i32 = arith.constant 0 : i32
    %9 = arith.cmpi eq, %c32_i32, %c0_i32 : i32
    %c1_i32 = arith.constant 1 : i32
    %10 = arith.select %9, %c1_i32, %c32_i32 : i32
    %11 = vector.broadcast %10 : i32 to vector<1x128xi32>
    %12 = arith.remsi %8, %11 : vector<1x128xi32>
    %c0_i32_9 = arith.constant 0 : i32
    %13 = vector.broadcast %c0_i32_9 : i32 to vector<1x128xi32>
    %14 = arith.cmpi ne, %12, %13 : vector<1x128xi32>
    %c0_i32_10 = arith.constant 0 : i32
    %15 = vector.broadcast %c0_i32_10 : i32 to vector<1x128xi32>
    %16 = arith.cmpi slt, %12, %15 : vector<1x128xi32>
    %c0_i32_11 = arith.constant 0 : i32
    %17 = arith.cmpi slt, %10, %c0_i32_11 : i32
    %18 = vector.broadcast %17 : i1 to vector<1x128xi1>
    %19 = vector.broadcast %18 : vector<1x128xi1> to vector<1x128xi1>
    %20 = arith.xori %16, %19 : vector<1x128xi1>
    %21 = arith.andi %20, %14 : vector<1x128xi1>
    %22 = vector.broadcast %10 : i32 to vector<1x128xi32>
    %23 = arith.addi %12, %22 : vector<1x128xi32>
    %24 = arith.select %21, %23, %12 : vector<1x128xi1>, vector<1x128xi32>
    %c16_i32 = arith.constant 16 : i32
    %25 = vector.broadcast %c16_i32 : i32 to vector<1x128xi32>
    %26 = arith.cmpi slt, %24, %25 : vector<1x128xi32>
    %27 = tpu.iota {dimensions = array<i32: 1>} : vector<1x32xi32>
    %c16_i32_12 = arith.constant 16 : i32
    %28 = vector.broadcast %c16_i32_12 : i32 to vector<1x32xi32>
    %29 = arith.cmpi slt, %27, %28 : vector<1x32xi32>
    %c0_i32_13 = arith.constant 0 : i32
    %c7_i32 = arith.constant 7 : i32
    %30 = vector.broadcast %c0_i32_13 : i32 to vector<1x32xi32>
    %31 = vector.broadcast %c7_i32 : i32 to vector<1x32xi32>
    %32 = arith.select %29, %30, %31 : vector<1x32xi1>, vector<1x32xi32>
    %33 = vector.broadcast %0 : vector<4x1xi32> to vector<4x32xi32>
    %34 = vector.broadcast %32 : vector<1x32xi32> to vector<4x32xi32>
    %35 = arith.cmpi sgt, %33, %34 : vector<4x32xi32>
    %c1_i32_14 = arith.constant 1 : i32
    %c6_i32 = arith.constant 6 : i32
    %36 = vector.broadcast %c1_i32_14 : i32 to vector<1x32xi32>
    %37 = vector.broadcast %c6_i32 : i32 to vector<1x32xi32>
    %38 = arith.select %29, %36, %37 : vector<1x32xi1>, vector<1x32xi32>
    %39 = vector.broadcast %0 : vector<4x1xi32> to vector<4x32xi32>
    %40 = vector.broadcast %38 : vector<1x32xi32> to vector<4x32xi32>
    %41 = arith.cmpi sgt, %39, %40 : vector<4x32xi32>
    %c2_i32 = arith.constant 2 : i32
    %c5_i32 = arith.constant 5 : i32
    %42 = vector.broadcast %c2_i32 : i32 to vector<1x32xi32>
    %43 = vector.broadcast %c5_i32 : i32 to vector<1x32xi32>
    %44 = arith.select %29, %42, %43 : vector<1x32xi1>, vector<1x32xi32>
    %45 = vector.broadcast %0 : vector<4x1xi32> to vector<4x32xi32>
    %46 = vector.broadcast %44 : vector<1x32xi32> to vector<4x32xi32>
    %47 = arith.cmpi sgt, %45, %46 : vector<4x32xi32>
    %c3_i32 = arith.constant 3 : i32
    %c4_i32 = arith.constant 4 : i32
    %48 = vector.broadcast %c3_i32 : i32 to vector<1x32xi32>
    %49 = vector.broadcast %c4_i32 : i32 to vector<1x32xi32>
    %50 = arith.select %29, %48, %49 : vector<1x32xi1>, vector<1x32xi32>
    %51 = vector.broadcast %0 : vector<4x1xi32> to vector<4x32xi32>
    %52 = vector.broadcast %50 : vector<1x32xi32> to vector<4x32xi32>
    %53 = arith.cmpi sgt, %51, %52 : vector<4x32xi32>
    %c4_i32_15 = arith.constant 4 : i32
    %c3_i32_16 = arith.constant 3 : i32
    %54 = vector.broadcast %c4_i32_15 : i32 to vector<1x32xi32>
    %55 = vector.broadcast %c3_i32_16 : i32 to vector<1x32xi32>
    %56 = arith.select %29, %54, %55 : vector<1x32xi1>, vector<1x32xi32>
    %57 = vector.broadcast %0 : vector<4x1xi32> to vector<4x32xi32>
    %58 = vector.broadcast %56 : vector<1x32xi32> to vector<4x32xi32>
    %59 = arith.cmpi sgt, %57, %58 : vector<4x32xi32>
    %c5_i32_17 = arith.constant 5 : i32
    %c2_i32_18 = arith.constant 2 : i32
    %60 = vector.broadcast %c5_i32_17 : i32 to vector<1x32xi32>
    %61 = vector.broadcast %c2_i32_18 : i32 to vector<1x32xi32>
    %62 = arith.select %29, %60, %61 : vector<1x32xi1>, vector<1x32xi32>
    %63 = vector.broadcast %0 : vector<4x1xi32> to vector<4x32xi32>
    %64 = vector.broadcast %62 : vector<1x32xi32> to vector<4x32xi32>
    %65 = arith.cmpi sgt, %63, %64 : vector<4x32xi32>
    %c6_i32_19 = arith.constant 6 : i32
    %c1_i32_20 = arith.constant 1 : i32
    %66 = vector.broadcast %c6_i32_19 : i32 to vector<1x32xi32>
    %67 = vector.broadcast %c1_i32_20 : i32 to vector<1x32xi32>
    %68 = arith.select %29, %66, %67 : vector<1x32xi1>, vector<1x32xi32>
    %69 = vector.broadcast %0 : vector<4x1xi32> to vector<4x32xi32>
    %70 = vector.broadcast %68 : vector<1x32xi32> to vector<4x32xi32>
    %71 = arith.cmpi sgt, %69, %70 : vector<4x32xi32>
    %c7_i32_21 = arith.constant 7 : i32
    %c0_i32_22 = arith.constant 0 : i32
    %72 = vector.broadcast %c7_i32_21 : i32 to vector<1x32xi32>
    %73 = vector.broadcast %c0_i32_22 : i32 to vector<1x32xi32>
    %74 = arith.select %29, %72, %73 : vector<1x32xi1>, vector<1x32xi32>
    %75 = vector.broadcast %0 : vector<4x1xi32> to vector<4x32xi32>
    %76 = vector.broadcast %74 : vector<1x32xi32> to vector<4x32xi32>
    %77 = arith.cmpi sgt, %75, %76 : vector<4x32xi32>
    %cst_23 = arith.constant 0.000000e+00 : f32
    %78 = vector.broadcast %cst_23 : f32 to vector<4x32xf32>
    %cst_24 = arith.constant 0.000000e+00 : f32
    %79 = vector.broadcast %cst_24 : f32 to vector<4x32xf32>
    %cst_25 = arith.constant dense<0.000000e+00> : vector<4x128xf32>
    %80 = tpu.matmul %78, %2, %cst_25 {dimension_numbers = #tpu.dot_dimension_numbers<[1], [0], [0], [1], [0, 0, 1, 1], [], []>} : vector<4x32xf32>, vector<32x128xf32>, vector<4x128xf32> -> vector<4x128xf32>
    %81 = vector.extract_strided_slice %7 {offsets = [0, 0], sizes = [4, 128], strides = [1, 1]} : vector<32x128xf32> to vector<4x128xf32>
    %82 = vector.extract_strided_slice %7 {offsets = [28, 0], sizes = [4, 128], strides = [1, 1]} : vector<32x128xf32> to vector<4x128xf32>
    %83 = vector.shape_cast %26 : vector<1x128xi1> to vector<1x128xi1>
    %84 = vector.broadcast %83 : vector<1x128xi1> to vector<4x128xi1>
    %85 = arith.select %84, %81, %82 : vector<4x128xi1>, vector<4x128xf32>
    %86 = arith.addf %85, %80 : vector<4x128xf32>
    %87 = vector.extract_strided_slice %86 {offsets = [0, 0], sizes = [4, 96], strides = [1, 1]} : vector<4x128xf32> to vector<4x96xf32>
    %88 = arith.negf %87 : vector<4x96xf32>
    %89 = math.exp %88 : vector<4x96xf32>
    %cst_26 = arith.constant 1.000000e+00 : f32
    %90 = vector.broadcast %cst_26 : f32 to vector<4x96xf32>
    %91 = arith.addf %90, %89 : vector<4x96xf32>
    %92 = arith.divf %90, %91 : vector<4x96xf32>
    %93 = vector.extract_strided_slice %86 {offsets = [0, 96], sizes = [4, 32], strides = [1, 1]} : vector<4x128xf32> to vector<4x32xf32>
    %94 = math.tanh %93 : vector<4x32xf32>
    %95 = vector.extract_strided_slice %92 {offsets = [0, 0], sizes = [4, 32], strides = [1, 1]} : vector<4x96xf32> to vector<4x32xf32>
    %96 = vector.extract_strided_slice %92 {offsets = [0, 32], sizes = [4, 32], strides = [1, 1]} : vector<4x96xf32> to vector<4x32xf32>
    %97 = vector.extract_strided_slice %92 {offsets = [0, 64], sizes = [4, 32], strides = [1, 1]} : vector<4x96xf32> to vector<4x32xf32>
    %98 = arith.mulf %96, %79 : vector<4x32xf32>
    %99 = arith.mulf %95, %94 : vector<4x32xf32>
    %100 = arith.addf %98, %99 : vector<4x32xf32>
    %101 = math.tanh %100 : vector<4x32xf32>
    %102 = arith.mulf %97, %101 : vector<4x32xf32>
    %103 = arith.select %35, %102, %78 : vector<4x32xi1>, vector<4x32xf32>
    %104 = arith.select %35, %100, %79 : vector<4x32xi1>, vector<4x32xf32>
    %cst_27 = arith.constant 0.000000e+00 : f32
    %105 = vector.broadcast %cst_27 : f32 to vector<4x32xf32>
    %106 = arith.select %35, %102, %105 : vector<4x32xi1>, vector<4x32xf32>
    %107 = vector.extract_strided_slice %106 {offsets = [0, 0], sizes = [4, 16], strides = [1, 1]} : vector<4x32xf32> to vector<4x16xf32>
    %108 = vector.extract_strided_slice %106 {offsets = [0, 16], sizes = [4, 16], strides = [1, 1]} : vector<4x32xf32> to vector<4x16xf32>
    %cst_28 = arith.constant dense<0.000000e+00> : vector<4x128xf32>
    %109 = tpu.matmul %103, %2, %cst_28 {dimension_numbers = #tpu.dot_dimension_numbers<[1], [0], [0], [1], [0, 0, 1, 1], [], []>} : vector<4x32xf32>, vector<32x128xf32>, vector<4x128xf32> -> vector<4x128xf32>
    %110 = vector.extract_strided_slice %7 {offsets = [4, 0], sizes = [4, 128], strides = [1, 1]} : vector<32x128xf32> to vector<4x128xf32>
    %111 = vector.extract_strided_slice %7 {offsets = [24, 0], sizes = [4, 128], strides = [1, 1]} : vector<32x128xf32> to vector<4x128xf32>
    %112 = vector.shape_cast %26 : vector<1x128xi1> to vector<1x128xi1>
    %113 = vector.broadcast %112 : vector<1x128xi1> to vector<4x128xi1>
    %114 = arith.select %113, %110, %111 : vector<4x128xi1>, vector<4x128xf32>
    %115 = arith.addf %114, %109 : vector<4x128xf32>
    %116 = vector.extract_strided_slice %115 {offsets = [0, 0], sizes = [4, 96], strides = [1, 1]} : vector<4x128xf32> to vector<4x96xf32>
    %117 = arith.negf %116 : vector<4x96xf32>
    %118 = math.exp %117 : vector<4x96xf32>
    %cst_29 = arith.constant 1.000000e+00 : f32
    %119 = vector.broadcast %cst_29 : f32 to vector<4x96xf32>
    %120 = arith.addf %119, %118 : vector<4x96xf32>
    %121 = arith.divf %119, %120 : vector<4x96xf32>
    %122 = vector.extract_strided_slice %115 {offsets = [0, 96], sizes = [4, 32], strides = [1, 1]} : vector<4x128xf32> to vector<4x32xf32>
    %123 = math.tanh %122 : vector<4x32xf32>
    %124 = vector.extract_strided_slice %121 {offsets = [0, 0], sizes = [4, 32], strides = [1, 1]} : vector<4x96xf32> to vector<4x32xf32>
    %125 = vector.extract_strided_slice %121 {offsets = [0, 32], sizes = [4, 32], strides = [1, 1]} : vector<4x96xf32> to vector<4x32xf32>
    %126 = vector.extract_strided_slice %121 {offsets = [0, 64], sizes = [4, 32], strides = [1, 1]} : vector<4x96xf32> to vector<4x32xf32>
    %127 = arith.mulf %125, %104 : vector<4x32xf32>
    %128 = arith.mulf %124, %123 : vector<4x32xf32>
    %129 = arith.addf %127, %128 : vector<4x32xf32>
    %130 = math.tanh %129 : vector<4x32xf32>
    %131 = arith.mulf %126, %130 : vector<4x32xf32>
    %132 = arith.select %41, %131, %103 : vector<4x32xi1>, vector<4x32xf32>
    %133 = arith.select %41, %129, %104 : vector<4x32xi1>, vector<4x32xf32>
    %cst_30 = arith.constant 0.000000e+00 : f32
    %134 = vector.broadcast %cst_30 : f32 to vector<4x32xf32>
    %135 = arith.select %41, %131, %134 : vector<4x32xi1>, vector<4x32xf32>
    %136 = vector.extract_strided_slice %135 {offsets = [0, 0], sizes = [4, 16], strides = [1, 1]} : vector<4x32xf32> to vector<4x16xf32>
    %137 = vector.extract_strided_slice %135 {offsets = [0, 16], sizes = [4, 16], strides = [1, 1]} : vector<4x32xf32> to vector<4x16xf32>
    %cst_31 = arith.constant dense<0.000000e+00> : vector<4x128xf32>
    %138 = tpu.matmul %132, %2, %cst_31 {dimension_numbers = #tpu.dot_dimension_numbers<[1], [0], [0], [1], [0, 0, 1, 1], [], []>} : vector<4x32xf32>, vector<32x128xf32>, vector<4x128xf32> -> vector<4x128xf32>
    %139 = vector.extract_strided_slice %7 {offsets = [8, 0], sizes = [4, 128], strides = [1, 1]} : vector<32x128xf32> to vector<4x128xf32>
    %140 = vector.extract_strided_slice %7 {offsets = [20, 0], sizes = [4, 128], strides = [1, 1]} : vector<32x128xf32> to vector<4x128xf32>
    %141 = vector.shape_cast %26 : vector<1x128xi1> to vector<1x128xi1>
    %142 = vector.broadcast %141 : vector<1x128xi1> to vector<4x128xi1>
    %143 = arith.select %142, %139, %140 : vector<4x128xi1>, vector<4x128xf32>
    %144 = arith.addf %143, %138 : vector<4x128xf32>
    %145 = vector.extract_strided_slice %144 {offsets = [0, 0], sizes = [4, 96], strides = [1, 1]} : vector<4x128xf32> to vector<4x96xf32>
    %146 = arith.negf %145 : vector<4x96xf32>
    %147 = math.exp %146 : vector<4x96xf32>
    %cst_32 = arith.constant 1.000000e+00 : f32
    %148 = vector.broadcast %cst_32 : f32 to vector<4x96xf32>
    %149 = arith.addf %148, %147 : vector<4x96xf32>
    %150 = arith.divf %148, %149 : vector<4x96xf32>
    %151 = vector.extract_strided_slice %144 {offsets = [0, 96], sizes = [4, 32], strides = [1, 1]} : vector<4x128xf32> to vector<4x32xf32>
    %152 = math.tanh %151 : vector<4x32xf32>
    %153 = vector.extract_strided_slice %150 {offsets = [0, 0], sizes = [4, 32], strides = [1, 1]} : vector<4x96xf32> to vector<4x32xf32>
    %154 = vector.extract_strided_slice %150 {offsets = [0, 32], sizes = [4, 32], strides = [1, 1]} : vector<4x96xf32> to vector<4x32xf32>
    %155 = vector.extract_strided_slice %150 {offsets = [0, 64], sizes = [4, 32], strides = [1, 1]} : vector<4x96xf32> to vector<4x32xf32>
    %156 = arith.mulf %154, %133 : vector<4x32xf32>
    %157 = arith.mulf %153, %152 : vector<4x32xf32>
    %158 = arith.addf %156, %157 : vector<4x32xf32>
    %159 = math.tanh %158 : vector<4x32xf32>
    %160 = arith.mulf %155, %159 : vector<4x32xf32>
    %161 = arith.select %47, %160, %132 : vector<4x32xi1>, vector<4x32xf32>
    %162 = arith.select %47, %158, %133 : vector<4x32xi1>, vector<4x32xf32>
    %cst_33 = arith.constant 0.000000e+00 : f32
    %163 = vector.broadcast %cst_33 : f32 to vector<4x32xf32>
    %164 = arith.select %47, %160, %163 : vector<4x32xi1>, vector<4x32xf32>
    %165 = vector.extract_strided_slice %164 {offsets = [0, 0], sizes = [4, 16], strides = [1, 1]} : vector<4x32xf32> to vector<4x16xf32>
    %166 = vector.extract_strided_slice %164 {offsets = [0, 16], sizes = [4, 16], strides = [1, 1]} : vector<4x32xf32> to vector<4x16xf32>
    %cst_34 = arith.constant dense<0.000000e+00> : vector<4x128xf32>
    %167 = tpu.matmul %161, %2, %cst_34 {dimension_numbers = #tpu.dot_dimension_numbers<[1], [0], [0], [1], [0, 0, 1, 1], [], []>} : vector<4x32xf32>, vector<32x128xf32>, vector<4x128xf32> -> vector<4x128xf32>
    %168 = vector.extract_strided_slice %7 {offsets = [12, 0], sizes = [4, 128], strides = [1, 1]} : vector<32x128xf32> to vector<4x128xf32>
    %169 = vector.extract_strided_slice %7 {offsets = [16, 0], sizes = [4, 128], strides = [1, 1]} : vector<32x128xf32> to vector<4x128xf32>
    %170 = vector.shape_cast %26 : vector<1x128xi1> to vector<1x128xi1>
    %171 = vector.broadcast %170 : vector<1x128xi1> to vector<4x128xi1>
    %172 = arith.select %171, %168, %169 : vector<4x128xi1>, vector<4x128xf32>
    %173 = arith.addf %172, %167 : vector<4x128xf32>
    %174 = vector.extract_strided_slice %173 {offsets = [0, 0], sizes = [4, 96], strides = [1, 1]} : vector<4x128xf32> to vector<4x96xf32>
    %175 = arith.negf %174 : vector<4x96xf32>
    %176 = math.exp %175 : vector<4x96xf32>
    %cst_35 = arith.constant 1.000000e+00 : f32
    %177 = vector.broadcast %cst_35 : f32 to vector<4x96xf32>
    %178 = arith.addf %177, %176 : vector<4x96xf32>
    %179 = arith.divf %177, %178 : vector<4x96xf32>
    %180 = vector.extract_strided_slice %173 {offsets = [0, 96], sizes = [4, 32], strides = [1, 1]} : vector<4x128xf32> to vector<4x32xf32>
    %181 = math.tanh %180 : vector<4x32xf32>
    %182 = vector.extract_strided_slice %179 {offsets = [0, 0], sizes = [4, 32], strides = [1, 1]} : vector<4x96xf32> to vector<4x32xf32>
    %183 = vector.extract_strided_slice %179 {offsets = [0, 32], sizes = [4, 32], strides = [1, 1]} : vector<4x96xf32> to vector<4x32xf32>
    %184 = vector.extract_strided_slice %179 {offsets = [0, 64], sizes = [4, 32], strides = [1, 1]} : vector<4x96xf32> to vector<4x32xf32>
    %185 = arith.mulf %183, %162 : vector<4x32xf32>
    %186 = arith.mulf %182, %181 : vector<4x32xf32>
    %187 = arith.addf %185, %186 : vector<4x32xf32>
    %188 = math.tanh %187 : vector<4x32xf32>
    %189 = arith.mulf %184, %188 : vector<4x32xf32>
    %190 = arith.select %53, %189, %161 : vector<4x32xi1>, vector<4x32xf32>
    %191 = arith.select %53, %187, %162 : vector<4x32xi1>, vector<4x32xf32>
    %cst_36 = arith.constant 0.000000e+00 : f32
    %192 = vector.broadcast %cst_36 : f32 to vector<4x32xf32>
    %193 = arith.select %53, %189, %192 : vector<4x32xi1>, vector<4x32xf32>
    %194 = vector.extract_strided_slice %193 {offsets = [0, 0], sizes = [4, 16], strides = [1, 1]} : vector<4x32xf32> to vector<4x16xf32>
    %195 = vector.extract_strided_slice %193 {offsets = [0, 16], sizes = [4, 16], strides = [1, 1]} : vector<4x32xf32> to vector<4x16xf32>
    %cst_37 = arith.constant dense<0.000000e+00> : vector<4x128xf32>
    %196 = tpu.matmul %190, %2, %cst_37 {dimension_numbers = #tpu.dot_dimension_numbers<[1], [0], [0], [1], [0, 0, 1, 1], [], []>} : vector<4x32xf32>, vector<32x128xf32>, vector<4x128xf32> -> vector<4x128xf32>
    %197 = vector.extract_strided_slice %7 {offsets = [16, 0], sizes = [4, 128], strides = [1, 1]} : vector<32x128xf32> to vector<4x128xf32>
    %198 = vector.extract_strided_slice %7 {offsets = [12, 0], sizes = [4, 128], strides = [1, 1]} : vector<32x128xf32> to vector<4x128xf32>
    %199 = vector.shape_cast %26 : vector<1x128xi1> to vector<1x128xi1>
    %200 = vector.broadcast %199 : vector<1x128xi1> to vector<4x128xi1>
    %201 = arith.select %200, %197, %198 : vector<4x128xi1>, vector<4x128xf32>
    %202 = arith.addf %201, %196 : vector<4x128xf32>
    %203 = vector.extract_strided_slice %202 {offsets = [0, 0], sizes = [4, 96], strides = [1, 1]} : vector<4x128xf32> to vector<4x96xf32>
    %204 = arith.negf %203 : vector<4x96xf32>
    %205 = math.exp %204 : vector<4x96xf32>
    %cst_38 = arith.constant 1.000000e+00 : f32
    %206 = vector.broadcast %cst_38 : f32 to vector<4x96xf32>
    %207 = arith.addf %206, %205 : vector<4x96xf32>
    %208 = arith.divf %206, %207 : vector<4x96xf32>
    %209 = vector.extract_strided_slice %202 {offsets = [0, 96], sizes = [4, 32], strides = [1, 1]} : vector<4x128xf32> to vector<4x32xf32>
    %210 = math.tanh %209 : vector<4x32xf32>
    %211 = vector.extract_strided_slice %208 {offsets = [0, 0], sizes = [4, 32], strides = [1, 1]} : vector<4x96xf32> to vector<4x32xf32>
    %212 = vector.extract_strided_slice %208 {offsets = [0, 32], sizes = [4, 32], strides = [1, 1]} : vector<4x96xf32> to vector<4x32xf32>
    %213 = vector.extract_strided_slice %208 {offsets = [0, 64], sizes = [4, 32], strides = [1, 1]} : vector<4x96xf32> to vector<4x32xf32>
    %214 = arith.mulf %212, %191 : vector<4x32xf32>
    %215 = arith.mulf %211, %210 : vector<4x32xf32>
    %216 = arith.addf %214, %215 : vector<4x32xf32>
    %217 = math.tanh %216 : vector<4x32xf32>
    %218 = arith.mulf %213, %217 : vector<4x32xf32>
    %219 = arith.select %59, %218, %190 : vector<4x32xi1>, vector<4x32xf32>
    %220 = arith.select %59, %216, %191 : vector<4x32xi1>, vector<4x32xf32>
    %cst_39 = arith.constant 0.000000e+00 : f32
    %221 = vector.broadcast %cst_39 : f32 to vector<4x32xf32>
    %222 = arith.select %59, %218, %221 : vector<4x32xi1>, vector<4x32xf32>
    %223 = vector.extract_strided_slice %222 {offsets = [0, 0], sizes = [4, 16], strides = [1, 1]} : vector<4x32xf32> to vector<4x16xf32>
    %224 = vector.extract_strided_slice %222 {offsets = [0, 16], sizes = [4, 16], strides = [1, 1]} : vector<4x32xf32> to vector<4x16xf32>
    %cst_40 = arith.constant dense<0.000000e+00> : vector<4x128xf32>
    %225 = tpu.matmul %219, %2, %cst_40 {dimension_numbers = #tpu.dot_dimension_numbers<[1], [0], [0], [1], [0, 0, 1, 1], [], []>} : vector<4x32xf32>, vector<32x128xf32>, vector<4x128xf32> -> vector<4x128xf32>
    %226 = vector.extract_strided_slice %7 {offsets = [20, 0], sizes = [4, 128], strides = [1, 1]} : vector<32x128xf32> to vector<4x128xf32>
    %227 = vector.extract_strided_slice %7 {offsets = [8, 0], sizes = [4, 128], strides = [1, 1]} : vector<32x128xf32> to vector<4x128xf32>
    %228 = vector.shape_cast %26 : vector<1x128xi1> to vector<1x128xi1>
    %229 = vector.broadcast %228 : vector<1x128xi1> to vector<4x128xi1>
    %230 = arith.select %229, %226, %227 : vector<4x128xi1>, vector<4x128xf32>
    %231 = arith.addf %230, %225 : vector<4x128xf32>
    %232 = vector.extract_strided_slice %231 {offsets = [0, 0], sizes = [4, 96], strides = [1, 1]} : vector<4x128xf32> to vector<4x96xf32>
    %233 = arith.negf %232 : vector<4x96xf32>
    %234 = math.exp %233 : vector<4x96xf32>
    %cst_41 = arith.constant 1.000000e+00 : f32
    %235 = vector.broadcast %cst_41 : f32 to vector<4x96xf32>
    %236 = arith.addf %235, %234 : vector<4x96xf32>
    %237 = arith.divf %235, %236 : vector<4x96xf32>
    %238 = vector.extract_strided_slice %231 {offsets = [0, 96], sizes = [4, 32], strides = [1, 1]} : vector<4x128xf32> to vector<4x32xf32>
    %239 = math.tanh %238 : vector<4x32xf32>
    %240 = vector.extract_strided_slice %237 {offsets = [0, 0], sizes = [4, 32], strides = [1, 1]} : vector<4x96xf32> to vector<4x32xf32>
    %241 = vector.extract_strided_slice %237 {offsets = [0, 32], sizes = [4, 32], strides = [1, 1]} : vector<4x96xf32> to vector<4x32xf32>
    %242 = vector.extract_strided_slice %237 {offsets = [0, 64], sizes = [4, 32], strides = [1, 1]} : vector<4x96xf32> to vector<4x32xf32>
    %243 = arith.mulf %241, %220 : vector<4x32xf32>
    %244 = arith.mulf %240, %239 : vector<4x32xf32>
    %245 = arith.addf %243, %244 : vector<4x32xf32>
    %246 = math.tanh %245 : vector<4x32xf32>
    %247 = arith.mulf %242, %246 : vector<4x32xf32>
    %248 = arith.select %65, %247, %219 : vector<4x32xi1>, vector<4x32xf32>
    %249 = arith.select %65, %245, %220 : vector<4x32xi1>, vector<4x32xf32>
    %cst_42 = arith.constant 0.000000e+00 : f32
    %250 = vector.broadcast %cst_42 : f32 to vector<4x32xf32>
    %251 = arith.select %65, %247, %250 : vector<4x32xi1>, vector<4x32xf32>
    %252 = vector.extract_strided_slice %251 {offsets = [0, 0], sizes = [4, 16], strides = [1, 1]} : vector<4x32xf32> to vector<4x16xf32>
    %253 = vector.extract_strided_slice %251 {offsets = [0, 16], sizes = [4, 16], strides = [1, 1]} : vector<4x32xf32> to vector<4x16xf32>
    %cst_43 = arith.constant dense<0.000000e+00> : vector<4x128xf32>
    %254 = tpu.matmul %248, %2, %cst_43 {dimension_numbers = #tpu.dot_dimension_numbers<[1], [0], [0], [1], [0, 0, 1, 1], [], []>} : vector<4x32xf32>, vector<32x128xf32>, vector<4x128xf32> -> vector<4x128xf32>
    %255 = vector.extract_strided_slice %7 {offsets = [24, 0], sizes = [4, 128], strides = [1, 1]} : vector<32x128xf32> to vector<4x128xf32>
    %256 = vector.extract_strided_slice %7 {offsets = [4, 0], sizes = [4, 128], strides = [1, 1]} : vector<32x128xf32> to vector<4x128xf32>
    %257 = vector.shape_cast %26 : vector<1x128xi1> to vector<1x128xi1>
    %258 = vector.broadcast %257 : vector<1x128xi1> to vector<4x128xi1>
    %259 = arith.select %258, %255, %256 : vector<4x128xi1>, vector<4x128xf32>
    %260 = arith.addf %259, %254 : vector<4x128xf32>
    %261 = vector.extract_strided_slice %260 {offsets = [0, 0], sizes = [4, 96], strides = [1, 1]} : vector<4x128xf32> to vector<4x96xf32>
    %262 = arith.negf %261 : vector<4x96xf32>
    %263 = math.exp %262 : vector<4x96xf32>
    %cst_44 = arith.constant 1.000000e+00 : f32
    %264 = vector.broadcast %cst_44 : f32 to vector<4x96xf32>
    %265 = arith.addf %264, %263 : vector<4x96xf32>
    %266 = arith.divf %264, %265 : vector<4x96xf32>
    %267 = vector.extract_strided_slice %260 {offsets = [0, 96], sizes = [4, 32], strides = [1, 1]} : vector<4x128xf32> to vector<4x32xf32>
    %268 = math.tanh %267 : vector<4x32xf32>
    %269 = vector.extract_strided_slice %266 {offsets = [0, 0], sizes = [4, 32], strides = [1, 1]} : vector<4x96xf32> to vector<4x32xf32>
    %270 = vector.extract_strided_slice %266 {offsets = [0, 32], sizes = [4, 32], strides = [1, 1]} : vector<4x96xf32> to vector<4x32xf32>
    %271 = vector.extract_strided_slice %266 {offsets = [0, 64], sizes = [4, 32], strides = [1, 1]} : vector<4x96xf32> to vector<4x32xf32>
    %272 = arith.mulf %270, %249 : vector<4x32xf32>
    %273 = arith.mulf %269, %268 : vector<4x32xf32>
    %274 = arith.addf %272, %273 : vector<4x32xf32>
    %275 = math.tanh %274 : vector<4x32xf32>
    %276 = arith.mulf %271, %275 : vector<4x32xf32>
    %277 = arith.select %71, %276, %248 : vector<4x32xi1>, vector<4x32xf32>
    %278 = arith.select %71, %274, %249 : vector<4x32xi1>, vector<4x32xf32>
    %cst_45 = arith.constant 0.000000e+00 : f32
    %279 = vector.broadcast %cst_45 : f32 to vector<4x32xf32>
    %280 = arith.select %71, %276, %279 : vector<4x32xi1>, vector<4x32xf32>
    %281 = vector.extract_strided_slice %280 {offsets = [0, 0], sizes = [4, 16], strides = [1, 1]} : vector<4x32xf32> to vector<4x16xf32>
    %282 = vector.extract_strided_slice %280 {offsets = [0, 16], sizes = [4, 16], strides = [1, 1]} : vector<4x32xf32> to vector<4x16xf32>
    %cst_46 = arith.constant dense<0.000000e+00> : vector<4x128xf32>
    %283 = tpu.matmul %277, %2, %cst_46 {dimension_numbers = #tpu.dot_dimension_numbers<[1], [0], [0], [1], [0, 0, 1, 1], [], []>} : vector<4x32xf32>, vector<32x128xf32>, vector<4x128xf32> -> vector<4x128xf32>
    %284 = vector.extract_strided_slice %7 {offsets = [28, 0], sizes = [4, 128], strides = [1, 1]} : vector<32x128xf32> to vector<4x128xf32>
    %285 = vector.extract_strided_slice %7 {offsets = [0, 0], sizes = [4, 128], strides = [1, 1]} : vector<32x128xf32> to vector<4x128xf32>
    %286 = vector.shape_cast %26 : vector<1x128xi1> to vector<1x128xi1>
    %287 = vector.broadcast %286 : vector<1x128xi1> to vector<4x128xi1>
    %288 = arith.select %287, %284, %285 : vector<4x128xi1>, vector<4x128xf32>
    %289 = arith.addf %288, %283 : vector<4x128xf32>
    %290 = vector.extract_strided_slice %289 {offsets = [0, 0], sizes = [4, 96], strides = [1, 1]} : vector<4x128xf32> to vector<4x96xf32>
    %291 = arith.negf %290 : vector<4x96xf32>
    %292 = math.exp %291 : vector<4x96xf32>
    %cst_47 = arith.constant 1.000000e+00 : f32
    %293 = vector.broadcast %cst_47 : f32 to vector<4x96xf32>
    %294 = arith.addf %293, %292 : vector<4x96xf32>
    %295 = arith.divf %293, %294 : vector<4x96xf32>
    %296 = vector.extract_strided_slice %289 {offsets = [0, 96], sizes = [4, 32], strides = [1, 1]} : vector<4x128xf32> to vector<4x32xf32>
    %297 = math.tanh %296 : vector<4x32xf32>
    %298 = vector.extract_strided_slice %295 {offsets = [0, 0], sizes = [4, 32], strides = [1, 1]} : vector<4x96xf32> to vector<4x32xf32>
    %299 = vector.extract_strided_slice %295 {offsets = [0, 32], sizes = [4, 32], strides = [1, 1]} : vector<4x96xf32> to vector<4x32xf32>
    %300 = vector.extract_strided_slice %295 {offsets = [0, 64], sizes = [4, 32], strides = [1, 1]} : vector<4x96xf32> to vector<4x32xf32>
    %301 = arith.mulf %299, %278 : vector<4x32xf32>
    %302 = arith.mulf %298, %297 : vector<4x32xf32>
    %303 = arith.addf %301, %302 : vector<4x32xf32>
    %304 = math.tanh %303 : vector<4x32xf32>
    %305 = arith.mulf %300, %304 : vector<4x32xf32>
    %cst_48 = arith.constant 0.000000e+00 : f32
    %306 = vector.broadcast %cst_48 : f32 to vector<4x32xf32>
    %307 = arith.select %77, %305, %306 : vector<4x32xi1>, vector<4x32xf32>
    %308 = vector.extract_strided_slice %307 {offsets = [0, 0], sizes = [4, 16], strides = [1, 1]} : vector<4x32xf32> to vector<4x16xf32>
    %309 = vector.extract_strided_slice %307 {offsets = [0, 16], sizes = [4, 16], strides = [1, 1]} : vector<4x32xf32> to vector<4x16xf32>
    %310 = tpu.concatenate %107, %309, %136, %282, %165, %253, %194, %224, %223, %195, %252, %166, %281, %137, %308, %108 in 1 : vector<4x16xf32>, vector<4x16xf32>, vector<4x16xf32>, vector<4x16xf32>, vector<4x16xf32>, vector<4x16xf32>, vector<4x16xf32>, vector<4x16xf32>, vector<4x16xf32>, vector<4x16xf32>, vector<4x16xf32>, vector<4x16xf32>, vector<4x16xf32>, vector<4x16xf32>, vector<4x16xf32>, vector<4x16xf32> -> vector<4x256xf32>
    %c0_49 = arith.constant 0 : index
    %c0_50 = arith.constant 0 : index
    %311 = vector.load %arg5[%c0_49, %c0_50] : memref<4x256xf32, #tpu.memory_space<vmem>>, vector<4x256xf32>
    tpu.vector_store %arg5[%c0_49, %c0_50], %310 {strides = array<i32>} : memref<4x256xf32, #tpu.memory_space<vmem>>, vector<4x256xf32>,
    return
  }
}

</mosaic_0001>

<bundles_post_ra>
// kernel: tpu_custom_call.1
= control target key start
LH: loop header
LB: loop body
LE: loop exit
PB: predicated region body
PF: predicated region fallthrough
CT: control target
= control target key end

     0   :  { %10 = vsyncpa [#allocation3], 0  ;;  %s1438_s0 = inlined_call_operand.hbm [shape: f32[32,32], index: 0, kind: input, shape index: {}]   ;;  %s1439_s1 = inlined_call_operand.vmem [shape: s32[4,1], index: 1, kind: input, shape index: {}]   ;;  %s1440_s2 = inlined_call_operand.hbm [shape: f32[32,128], index: 2, kind: input, shape index: {}]   ;;  %s1441_s3 = inlined_call_operand.hbm [shape: f32[32,128], index: 3, kind: input, shape index: {}]   ;;  %s1442_s4 = inlined_call_operand.vmem [shape: f32[1,128], index: 4, kind: input, shape index: {}]   ;;  %s1443_s5 = inlined_call_operand.hbm [shape: f32[4,256], index: 5, kind: output, shape index: {}]  }
   0x1   :  { %11 = vsyncpa [#allocation6], 0 }
   0x2   :  { %12 = vsyncpa [#allocation4], 0  ;;  %s32_s20 = sshll.u32 %s1440_s2, 4  ;;  %s1098_s21 = smov [#allocation5]   ;;  %s33_s20 = int_to_ptr.hbm [resolvable:$true] %s32_s20 }
   0x3   :  { %s34_s22 = sshll.u32 %s1098_s21, 4  ;;  %s17_s25 = sshll.u32 %s1438_s0, 4  ;;  %s35_s22 = int_to_ptr.vmem [resolvable:$true] %s34_s22  ;;  %s18_s25 = int_to_ptr.hbm [resolvable:$true] %s17_s25 }
   0x4   :  { %s1099_s26 = smov 128   ;;  %s1100_s27 = smov 8  }
   0x5   :  { %40 = dma.hbm_to_vmem [thread:$0]  %s33_s20, 512, %s35_s22, [#allocation6], %s1099_s26, %s1099_s26, %s1100_s27  }
   0x6   :  { %s1101_s28 = smov [#allocation2]   ;;  %s45_s7 = sshll.u32 %s1441_s3, 4  ;;  %s46_s7 = int_to_ptr.hbm [resolvable:$true] %s45_s7 }
   0x7   :  { %s19_s29 = sshll.u32 %s1101_s28, 4  ;;  %s1102_s2 = smov [#allocation7]   ;;  %s20_s29 = int_to_ptr.vmem [resolvable:$true] %s19_s29 }
   0x8   :  { %25 = dma.hbm_to_vmem [thread:$0]  %s18_s25, 512, %s20_s29, [#allocation3], %s1099_s26, %s1099_s26, %s1100_s27  }
   0x9   :  { %s47_s8 = sshll.u32 %s1102_s2, 4  ;;  %s48_s8 = int_to_ptr.vmem [resolvable:$true] %s47_s8 }
   0xa   :  { %53 = dma.hbm_to_vmem [thread:$0]  %s46_s7, 512, %s48_s8, [#allocation6], %s1099_s26, %s1099_s26, %s1100_s27  }
   0xb   :  { %1092 = dma.done.wait [#allocation3], 512  }
   0xc   :  { %1093 = vsyncadd [#allocation3], 4294966784 }
   0xd   :  { %1094 = dma.done.wait [#allocation6], 1024  }
   0xe   :  { %1095 = vsyncadd [#allocation6], 4294966272  ;;  %v72_v0 = vld [vmem:[#allocation5 + $0x18] sm:$0xff]  ;;  %v71_v1 = vld [vmem:[#allocation5 + $0x10] sm:$0xff]  ;;  %vm85_vm0 = vcmask 261120   ;;  %v1103_v10 = vmov 0.0   ;;  %v127_v11 = vlaneseq }
   0xf   :  { %907 = vmatpush.msra.mxu3 %v72_v0  ;;  %110 = vmatpush.msra.mxu0 %v72_v0  ;;  %v70_v2 = vld [vmem:[#allocation5 + $0x8] sm:$0xff]  ;;  %v1155_v3 = vld [vmem:[#allocation7 + $0x18] sm:$0xff]  ;;  %v1157_v4 = vld [vmem:[#allocation7 + $0x10] sm:$0xff]  ;;  %v1105_v42 = vmov 0   ;;  %s1106_s11 = smov 64   ;;  %s1107_s12 = smov 96  }
  0x10   :  { %v69_v5 = vld [vmem:[#allocation5] sm:$0xff]  ;;  %177 = vmatpush.msra.mxu1 %v1155_v3  ;;  %254 = vmatpush.msra.mxu2 %v1155_v3  ;;  %v81_v6 = vld [vmem:[#allocation2 + $0x18] sm:$0xff]  ;;  %v1162_v8 = vld [vmem:[#allocation7 + $0x8] sm:$0xff]  ;;  %v1198_v13 = vand.u32 127, %v127_v11  ;;  %v1108_v51 = vmov 7   ;;  %s877_s16 = sshll.u32 %s1443_s5, 4  ;;  %s878_s16 = int_to_ptr.hbm [resolvable:$true] %s877_s16 }
  0x11   :  { %908 = vmatpush.msra.mxu3 %v71_v1  ;;  %111 = vmatpush.msra.mxu0 %v71_v1  ;;  %v78_v7 = vld [vmem:[#allocation2] sm:$0xff] }
  0x12   :  { %178 = vmatpush.msra.mxu1 %v1157_v4  ;;  %255 = vmatpush.msra.mxu2 %v1157_v4  ;;  %v1167_v9 = vld [vmem:[#allocation7] sm:$0xff]  ;;  %v133_v16 = vand.u32 31, %v1198_v13  ;;  %vm142_vm6 = vcmp.lt.s32.totalorder %v1198_v13, 16 }
  0x13   :  { %909 = vmatpush.msra.mxu3 %v70_v2  ;;  %112 = vmatpush.msra.mxu0 %v70_v2  ;;  %v1196_v12 = vld [vmem:[%s1442_s4] ss:$0 sm:$0xff]  ;;  %s1104_s4 = smov 32   ;;  %v143_v52 = vsel %vm142_vm6, 0, %v1108_v51 }
  0x14   :  { %179 = vmatpush.msra.mxu1 %v1162_v8  ;;  %256 = vmatpush.msra.mxu2 %v1162_v8  ;;  %vm1202_vm1 = vcmp.lt.s32.totalorder %v133_v16, 16  ;;  %v68_v47 = vld [vmem:[%s1439_s1] sm:$0xf]  ;;  %s1115_s1 = smov [#allocation8]  }
  0x15   :  { %910 = vmatpush.msra.mxu3 %v69_v5  ;;  %113 = vmatpush.msra.mxu0 %v69_v5  ;;  %s875_s13 = sshll.u32 %s1115_s1, 4  ;;  %s876_s13 = int_to_ptr.vmem [resolvable:$true] %s875_s13 }
  0x16   :  { %891 = vmatmul.msk.f32.vlgmr.msra.gmra.mxu3 %vm85_vm0, %v81_v6  ;;  %888 = vmatmul.msk.f32.vlgmr.msra.gmra.mxu0 %vm85_vm0, %v78_v7 }
  0x17   :  { %336 = vmatpush.msrb.mxu3 %v1155_v3  ;;  %180 = vmatpush.msra.mxu1 %v1167_v9 }
  0x18   :  { %257 = vmatpush.msra.mxu2 %v1167_v9  ;;  %181 = vmatmul.f32.vlgmr.msra.gmra.mxu1 %v1103_v10 }
  0x19   :  { %337 = vmatpush.msrb.mxu3 %v1157_v4  ;;  %416 = vmatpush.msrb.mxu1 %v1155_v3 }
  0x1a   :  { %498 = vmatpush.msrb.mxu2 %v1155_v3  ;;  %929 = vset.pattern.permute.xlu1 %v1105_v42 }
  0x1b   :  { %338 = vmatpush.msrb.mxu3 %v1162_v8  ;;  %417 = vmatpush.msrb.mxu1 %v1157_v4 }
  0x1c   :  { %499 = vmatpush.msrb.mxu2 %v1157_v4  ;;  %930 = vset.pattern.permute.xlu0 %v1105_v42 }
  0x1d   :  { %339 = vmatpush.msrb.mxu3 %v1167_v9  ;;  %418 = vmatpush.msrb.mxu1 %v1162_v8 }
  0x1e   :  { %500 = vmatpush.msrb.mxu2 %v1162_v8 }
  0x1f   :  { %578 = vmatpush.msra.mxu3 %v1155_v3  ;;  %419 = vmatpush.msrb.mxu1 %v1167_v9 }
  0x20   :  { %501 = vmatpush.msrb.mxu2 %v1167_v9 }
  0x21   :  { %579 = vmatpush.msra.mxu3 %v1157_v4  ;;  %660 = vmatpush.msra.mxu1 %v1155_v3 }
  0x23   :  { %580 = vmatpush.msra.mxu3 %v1162_v8  ;;  %661 = vmatpush.msra.mxu1 %v1157_v4 }
  0x25   :  { %581 = vmatpush.msra.mxu3 %v1167_v9  ;;  %662 = vmatpush.msra.mxu1 %v1162_v8 }
  0x27   :  { %663 = vmatpush.msra.mxu1 %v1167_v9 }
  0x93   :  { %v115_v14 = vpop.f32.mrf.mxu0 }
  0x94   :  { %v116_v15 = vadd.f32 %v1196_v12, %v115_v14 }
  0x95   :  { %v182_v22 = vpop.f32.mrf.mxu1 }
  0x96   :  { %v669_v17 = vrot.slane %v116_v15, 4 }
  0x99   :  { %v124_v18 = vpop.f32.mrf.mxu3 }
  0x9a   :  { %v125_v20 = vadd.f32 %v1196_v12, %v124_v18 }
  0x9c   :  { %v188_v21 = vrot.slane %v125_v20, 4  ;;  %v1209_v23 = vsel %vm1202_vm1, %v125_v20, %v669_v17 }
  0x9e   :  { %v1213_v24 = vsel %vm1202_vm1, %v116_v15, %v188_v21 }
  0x9f   :  { %v191_v25 = vadd.f32 %v1213_v24, %v182_v22  ;;  %v79_v22 = vld [vmem:[#allocation2 + $0x8] sm:$0xff] }
  0xa0   :  { %889 = vmatmul.msk.f32.gmra.mxu0 %vm85_vm0, %v79_v22 }
  0xa1   :  { %932 = vtanh.f32 %v191_v25  ;;  %v892_v27 = vmul.f32 -1.442695, %v191_v25 }
  0xa3   :  { %934 = vpow2.f32 %v892_v27 }
  0xa7   :  { %v933_v26 = vpop.eup %932 }
  0xa8   :  { %214 = vrot.lane.b32.xlu0 %v933_v26, %s1104_s4 }
  0xa9   :  { %v935_v28 = vpop.eup %934 }
  0xaa   :  { %v195_v29 = vadd.f32 1.0, %v935_v28  ;;  %v1109_v28 = vmov 6  }
  0xac   :  { %936 = vrcp.f32 %v195_v29  ;;  %v207_v35 = vand.u32 2147483648, %v195_v29  ;;  %vm201_vm3 = vweird.f32 %v195_v29  ;;  %v205_v36 = vand.u32 2147483647, %v195_v29 }
  0xae   :  { %v208_v38 = vor.u32 1.1754944e-38, %v207_v35  ;;  %vm206_vm5 = vcmp.eq.f32.partialorder %v205_v36, 8.507059e+37 }
  0xb2   :  { %v937_v30 = vpop.eup %936 }
  0xb3   :  { %v197_v31 = vmul.f32 %v937_v30, %v195_v29  ;;  %vm202_vm2 = vweird.f32 %v937_v30  ;;  %v1251_v29 = vsel %vm142_vm6, 1, %v1109_v28 }
  0xb4   :  { %vm203_vm4 = vmor %vm201_vm3, %vm202_vm2 }
  0xb5   :  { %v198_v32 = vsub.f32 1.0, %v197_v31 }
  0xb7   :  { %v199_v33 = vmul.f32 %v937_v30, %v198_v32 }
  0xb9   :  { %v200_v34 = vadd.f32 %v937_v30, %v199_v33 }
  0xbb   :  { %v204_v37 = vsel %vm203_vm4, %v937_v30, %v200_v34 }
  0xbc   :  { %v209_v40 = vsel %vm206_vm5, %v208_v38, %v204_v37 }
  0xbd   :  { %v212_v43 = vmul.f32 0.0, %v209_v40 }
 0x11a   :  { %v215_v39 = vpop.permute.xlu0 %214 }
 0x11b   :  { %v217_v41 = vmul.f32 %v215_v39, %v209_v40 }
 0x11d   :  { %219 = vrot.lane.b32.xlu0 %v217_v41, %s1104_s4  ;;  %v118_v34 = vpop.f32.mrf.mxu0 }
 0x11e   :  { %v1271_v37 = vadd.f32 %v1196_v12, %v118_v34 }
 0x18f   :  { %v220_v44 = vpop.permute.xlu0 %219 }
 0x190   :  { %v222_v45 = vadd.f32 %v220_v44, %v212_v43 }
 0x192   :  { %938 = vtanh.f32 %v222_v45 }
 0x198   :  { %v939_v46 = vpop.eup %938 }
 0x199   :  { %225 = vrot.lane.b32.xlu1 %v939_v46, %s1104_s4 }
 0x1a1   :  { %145 = vperm.xlu1 %929, %v68_v47  }
 0x20b   :  { %v226_v48 = vpop.permute.xlu1 %225 }
 0x20c   :  { %v228_v49 = vmul.f32 %v226_v48, %v209_v40 }
 0x20e   :  { %230 = vrot.lane.b32.xlu2 %v228_v49, %s1106_s11 }
 0x213   :  { %v1227_v50 = vpop.permute.xlu1 %145 }
 0x214   :  { %vm147_vm7 = vcmp.gt.s32.totalorder %v1227_v50, %v143_v52  ;;  %vm149_vm12 = vcmp.gt.s32.totalorder %v1227_v50, %v1251_v29 }
 0x216   :  { %235 = vrot.lane.b32.xlu2 %v222_v45, %s1107_s12 }
 0x268   :  { %v231_v53 = vpop.permute.xlu2 %230 }
 0x269   :  { %v1232_v54 = vsel %vm147_vm7, %v231_v53, 0.0 }
 0x26a   :  { %893 = vmatmul.msk.f32.vlgmr.msra.gmra.mxu2 %vm85_vm0, %v1232_v54 }
 0x26b   :  { %740 = vmatpush.msra.mxu2 %v1155_v3 }
 0x26d   :  { %741 = vmatpush.msra.mxu2 %v1157_v4 }
 0x26f   :  { %742 = vmatpush.msra.mxu2 %v1162_v8 }
 0x270   :  { %v236_v55 = vpop.permute.xlu2 %235 }
 0x271   :  { %v238_v56 = vsel %vm147_vm7, %v236_v55, 0.0  ;;  %743 = vmatpush.msra.mxu2 %v1167_v9 }
 0x272   :  { %v287_v57 = vrot.slane %v238_v56, 4 }
 0x274   :  { %288 = vrot.lane.b32.xlu1 %v287_v57, %s1104_s4 }
 0x2e6   :  { %v289_v15 = vpop.permute.xlu1 %288 }
 0x2ed   :  { %v259_v58 = vpop.f32.mrf.mxu2 }
 0x2ee   :  { %v263_v59 = vrot.slane %v259_v58, 4 }
 0x2f0   :  { %v265_v60 = vadd.f32 %v263_v59, %v1213_v24  ;;  %v80_v24 = vld [vmem:[#allocation2 + $0x10] sm:$0xff] }
 0x2f1   :  { %890 = vmatmul.msk.f32.gmra.mxu0 %vm85_vm0, %v80_v24 }
 0x2f2   :  { %940 = vtanh.f32 %v265_v60  ;;  %v894_v62 = vmul.f32 -1.442695, %v265_v60 }
 0x2f4   :  { %942 = vpow2.f32 %v894_v62 }
 0x2f8   :  { %v941_v61 = vpop.eup %940 }
 0x2f9   :  { %293 = vrot.lane.b32.xlu0 %v941_v61, %s1104_s4 }
 0x2fa   :  { %v943_v63 = vpop.eup %942 }
 0x2fb   :  { %v269_v0 = vadd.f32 1.0, %v943_v63 }
 0x2fd   :  { %944 = vrcp.f32 %v269_v0  ;;  %v281_v6 = vand.u32 2147483648, %v269_v0  ;;  %vm275_vm9 = vweird.f32 %v269_v0  ;;  %v279_v7 = vand.u32 2147483647, %v269_v0 }
 0x2ff   :  { %v282_v9 = vor.u32 1.1754944e-38, %v281_v6  ;;  %vm280_vm11 = vcmp.eq.f32.partialorder %v279_v7, 8.507059e+37 }
 0x303   :  { %v945_v1 = vpop.eup %944 }
 0x304   :  { %v271_v2 = vmul.f32 %v945_v1, %v269_v0  ;;  %vm276_vm8 = vweird.f32 %v945_v1 }
 0x305   :  { %vm277_vm10 = vmor %vm275_vm9, %vm276_vm8 }
 0x306   :  { %v272_v3 = vsub.f32 1.0, %v271_v2 }
 0x308   :  { %v273_v4 = vmul.f32 %v945_v1, %v272_v3  ;;  %v1110_v3 = vmov 5  }
 0x30a   :  { %v274_v5 = vadd.f32 %v945_v1, %v273_v4  ;;  %v1283_v4 = vsel %vm142_vm6, 2, %v1110_v3 }
 0x30b   :  { %vm151_vm3 = vcmp.gt.s32.totalorder %v1227_v50, %v1283_v4 }
 0x30c   :  { %v278_v8 = vsel %vm277_vm10, %v945_v1, %v274_v5 }
 0x30d   :  { %v283_v11 = vsel %vm280_vm11, %v282_v9, %v278_v8 }
 0x30e   :  { %v291_v16 = vmul.f32 %v289_v15, %v283_v11 }
 0x36b   :  { %v294_v10 = vpop.permute.xlu0 %293 }
 0x36c   :  { %v296_v14 = vmul.f32 %v294_v10, %v283_v11 }
 0x36e   :  { %298 = vrot.lane.b32.xlu2 %v296_v14, %s1104_s4  ;;  %v121_v35 = vpop.f32.mrf.mxu0 }
 0x36f   :  { %v1268_v36 = vadd.f32 %v1196_v12, %v121_v35 }
 0x371   :  { %v345_v38 = vrot.slane %v1268_v36, 4 }
 0x373   :  { %v347_v40 = vsel %vm1202_vm1, %v1271_v37, %v345_v38 }
 0x3c8   :  { %v299_v17 = vpop.permute.xlu2 %298 }
 0x3c9   :  { %v301_v18 = vadd.f32 %v299_v17, %v291_v16 }
 0x3cb   :  { %946 = vtanh.f32 %v301_v18  ;;  %v315_v20 = vrot.slane %v301_v18, 4 }
 0x3cd   :  { %316 = vrot.lane.b32.xlu2 %v315_v20, %s1107_s12 }
 0x3d1   :  { %v947_v21 = vpop.eup %946 }
 0x3d2   :  { %304 = vrot.lane.b32.xlu0 %v947_v21, %s1104_s4 }
 0x427   :  { %v317_v30 = vpop.permute.xlu2 %316 }
 0x428   :  { %v319_v31 = vsel %vm149_vm12, %v317_v30, %v238_v56 }
 0x444   :  { %v305_v25 = vpop.permute.xlu0 %304 }
 0x445   :  { %v307_v26 = vmul.f32 %v305_v25, %v283_v11 }
 0x447   :  { %v309_v27 = vrot.slane %v307_v26, 4 }
 0x449   :  { %310 = vrot.lane.b32.xlu1 %v309_v27, %s1106_s11 }
 0x451   :  { %370 = vrot.lane.b32.xlu1 %v319_v31, %s1104_s4 }
 0x4bb   :  { %v1259_v32 = vpop.permute.xlu1 %310 }
 0x4bc   :  { %v313_v33 = vsel %vm149_vm12, %v1259_v32, %v1232_v54 }
 0x4bd   :  { %895 = vmatmul.msk.f32.vlgmr.msrb.gmra.mxu3 %vm85_vm0, %v313_v33 }
 0x4c3   :  { %v371_v60 = vpop.permute.xlu1 %370 }
 0x540   :  { %v341_v39 = vpop.f32.mrf.mxu3 }
 0x541   :  { %v348_v41 = vadd.f32 %v347_v40, %v341_v39 }
 0x543   :  { %948 = vtanh.f32 %v348_v41  ;;  %v896_v44 = vmul.f32 -1.442695, %v348_v41 }
 0x545   :  { %950 = vpow2.f32 %v896_v44 }
 0x549   :  { %v949_v43 = vpop.eup %948 }
 0x54a   :  { %375 = vrot.lane.b32.xlu0 %v949_v43, %s1104_s4 }
 0x54b   :  { %v951_v45 = vpop.eup %950 }
 0x54c   :  { %v352_v46 = vadd.f32 1.0, %v951_v45 }
 0x54e   :  { %952 = vrcp.f32 %v352_v46  ;;  %v364_v52 = vand.u32 2147483648, %v352_v46  ;;  %vm358_vm14 = vweird.f32 %v352_v46  ;;  %v362_v53 = vand.u32 2147483647, %v352_v46 }
 0x550   :  { %v365_v56 = vor.u32 1.1754944e-38, %v364_v52  ;;  %vm363_vm2 = vcmp.eq.f32.partialorder %v362_v53, 8.507059e+37  ;;  %v507_v53 = vrot.slane %v1271_v37, 4 }
 0x554   :  { %v953_v47 = vpop.eup %952 }
 0x555   :  { %v354_v12 = vmul.f32 %v953_v47, %v352_v46  ;;  %vm359_vm13 = vweird.f32 %v953_v47 }
 0x556   :  { %vm360_vm15 = vmor %vm358_vm14, %vm359_vm13 }
 0x557   :  { %v355_v48 = vsub.f32 1.0, %v354_v12 }
 0x559   :  { %v356_v49 = vmul.f32 %v953_v47, %v355_v48 }
 0x55b   :  { %v357_v51 = vadd.f32 %v953_v47, %v356_v49 }
 0x55d   :  { %v361_v55 = vsel %vm360_vm15, %v953_v47, %v357_v51  ;;  %v1111_v47 = vmov 4  }
 0x55e   :  { %v366_v58 = vsel %vm363_vm2, %v365_v56, %v361_v55  ;;  %v1306_v12 = vsel %vm142_vm6, 3, %v1111_v47  ;;  %v509_v56 = vsel %vm1202_vm1, %v1268_v36, %v507_v53 }
 0x55f   :  { %v373_v61 = vmul.f32 %v371_v60, %v366_v58  ;;  %vm153_vm9 = vcmp.gt.s32.totalorder %v1227_v50, %v1306_v12 }
 0x5bc   :  { %v376_v57 = vpop.permute.xlu0 %375 }
 0x5bd   :  { %v378_v59 = vmul.f32 %v376_v57, %v366_v58 }
 0x5bf   :  { %380 = vrot.lane.b32.xlu2 %v378_v59, %s1104_s4 }
 0x619   :  { %v381_v62 = vpop.permute.xlu2 %380 }
 0x61a   :  { %v383_v63 = vadd.f32 %v381_v62, %v373_v61 }
 0x61c   :  { %954 = vtanh.f32 %v383_v63  ;;  %396 = vrot.lane.b32.xlu2 %v383_v63, %s1107_s12 }
 0x622   :  { %v955_v0 = vpop.eup %954 }
 0x623   :  { %386 = vrot.lane.b32.xlu0 %v955_v0, %s1104_s4 }
 0x676   :  { %v397_v5 = vpop.permute.xlu2 %396 }
 0x677   :  { %v399_v6 = vsel %vm151_vm3, %v397_v5, %v319_v31 }
 0x678   :  { %v449_v7 = vrot.slane %v399_v6, 4 }
 0x695   :  { %v387_v1 = vpop.permute.xlu0 %386 }
 0x696   :  { %v389_v2 = vmul.f32 %v387_v1, %v366_v58 }
 0x698   :  { %391 = vrot.lane.b32.xlu1 %v389_v2, %s1106_s11 }
 0x6a0   :  { %450 = vrot.lane.b32.xlu1 %v449_v7, %s1104_s4 }
 0x70a   :  { %v1292_v8 = vpop.permute.xlu1 %391 }
 0x70b   :  { %v394_v9 = vsel %vm151_vm3, %v1292_v8, %v313_v33 }
 0x70c   :  { %897 = vmatmul.msk.f32.vlgmr.msrb.gmra.mxu1 %vm85_vm0, %v394_v9 }
 0x712   :  { %v451_v35 = vpop.permute.xlu1 %450 }
 0x789   :  { %v421_v10 = vpop.f32.mrf.mxu1 }
 0x78a   :  { %v425_v11 = vrot.slane %v421_v10, 4 }
 0x78c   :  { %v427_v14 = vadd.f32 %v425_v11, %v347_v40 }
 0x78e   :  { %956 = vtanh.f32 %v427_v14  ;;  %v898_v16 = vmul.f32 -1.442695, %v427_v14 }
 0x790   :  { %958 = vpow2.f32 %v898_v16 }
 0x794   :  { %v957_v15 = vpop.eup %956 }
 0x795   :  { %455 = vrot.lane.b32.xlu0 %v957_v15, %s1104_s4 }
 0x796   :  { %v959_v17 = vpop.eup %958 }
 0x797   :  { %v431_v18 = vadd.f32 1.0, %v959_v17 }
 0x799   :  { %960 = vrcp.f32 %v431_v18  ;;  %v443_v26 = vand.u32 2147483648, %v431_v18  ;;  %vm437_vm5 = vweird.f32 %v431_v18  ;;  %v441_v27 = vand.u32 2147483647, %v431_v18 }
 0x79b   :  { %v444_v30 = vor.u32 1.1754944e-38, %v443_v26  ;;  %vm442_vm8 = vcmp.eq.f32.partialorder %v441_v27, 8.507059e+37 }
 0x79f   :  { %v961_v20 = vpop.eup %960 }
 0x7a0   :  { %v433_v21 = vmul.f32 %v961_v20, %v431_v18  ;;  %vm438_vm4 = vweird.f32 %v961_v20  ;;  %v1112_v18 = vmov 3  }
 0x7a1   :  { %vm439_vm7 = vmor %vm437_vm5, %vm438_vm4 }
 0x7a2   :  { %v434_v22 = vsub.f32 1.0, %v433_v21 }
 0x7a4   :  { %v435_v24 = vmul.f32 %v961_v20, %v434_v22 }
 0x7a6   :  { %v436_v25 = vadd.f32 %v961_v20, %v435_v24 }
 0x7a8   :  { %v440_v28 = vsel %vm439_vm7, %v961_v20, %v436_v25  ;;  %v1331_v20 = vsel %vm142_vm6, 4, %v1112_v18 }
 0x7a9   :  { %v445_v33 = vsel %vm442_vm8, %v444_v30, %v440_v28  ;;  %vm155_vm14 = vcmp.gt.s32.totalorder %v1227_v50, %v1331_v20 }
 0x7aa   :  { %v453_v38 = vmul.f32 %v451_v35, %v445_v33 }
 0x807   :  { %v456_v31 = vpop.permute.xlu0 %455 }
 0x808   :  { %v458_v34 = vmul.f32 %v456_v31, %v445_v33 }
 0x80a   :  { %460 = vrot.lane.b32.xlu2 %v458_v34, %s1104_s4 }
 0x864   :  { %v461_v39 = vpop.permute.xlu2 %460 }
 0x865   :  { %v463_v40 = vadd.f32 %v461_v39, %v453_v38 }
 0x867   :  { %962 = vtanh.f32 %v463_v40  ;;  %v477_v41 = vrot.slane %v463_v40, 4 }
 0x869   :  { %478 = vrot.lane.b32.xlu2 %v477_v41, %s1107_s12 }
 0x86d   :  { %v963_v43 = vpop.eup %962 }
 0x86e   :  { %466 = vrot.lane.b32.xlu0 %v963_v43, %s1104_s4 }
 0x8c3   :  { %v479_v48 = vpop.permute.xlu2 %478 }
 0x8c4   :  { %v481_v49 = vsel %vm153_vm9, %v479_v48, %v399_v6 }
 0x8e0   :  { %v467_v44 = vpop.permute.xlu0 %466 }
 0x8e1   :  { %v469_v45 = vmul.f32 %v467_v44, %v445_v33 }
 0x8e3   :  { %v471_v46 = vrot.slane %v469_v45, 4 }
 0x8e5   :  { %472 = vrot.lane.b32.xlu1 %v471_v46, %s1106_s11 }
 0x8ed   :  { %532 = vrot.lane.b32.xlu1 %v481_v49, %s1104_s4 }
 0x957   :  { %v1314_v51 = vpop.permute.xlu1 %472 }
 0x958   :  { %v475_v52 = vsel %vm153_vm9, %v1314_v51, %v394_v9 }
 0x959   :  { %899 = vmatmul.msk.f32.vlgmr.msrb.gmra.mxu2 %vm85_vm0, %v475_v52 }
 0x95f   :  { %v533_v9 = vpop.permute.xlu1 %532 }
 0x9dc   :  { %v503_v55 = vpop.f32.mrf.mxu2 }
 0x9dd   :  { %v510_v57 = vadd.f32 %v509_v56, %v503_v55 }
 0x9df   :  { %964 = vtanh.f32 %v510_v57  ;;  %v900_v59 = vmul.f32 -1.442695, %v510_v57 }
 0x9e1   :  { %966 = vpow2.f32 %v900_v59 }
 0x9e5   :  { %v965_v58 = vpop.eup %964 }
 0x9e6   :  { %537 = vrot.lane.b32.xlu0 %v965_v58, %s1104_s4 }
 0x9e7   :  { %v967_v60 = vpop.eup %966 }
 0x9e8   :  { %v514_v61 = vadd.f32 1.0, %v967_v60 }
 0x9ea   :  { %968 = vrcp.f32 %v514_v61  ;;  %v526_v2 = vand.u32 2147483648, %v514_v61  ;;  %vm520_vm11 = vweird.f32 %v514_v61  ;;  %v524_v19 = vand.u32 2147483647, %v514_v61 }
 0x9ec   :  { %v527_v3 = vor.u32 1.1754944e-38, %v526_v2  ;;  %vm525_vm13 = vcmp.eq.f32.partialorder %v524_v19, 8.507059e+37 }
 0x9f0   :  { %v969_v62 = vpop.eup %968 }
 0x9f1   :  { %v516_v63 = vmul.f32 %v969_v62, %v514_v61  ;;  %vm521_vm10 = vweird.f32 %v969_v62 }
 0x9f2   :  { %vm522_vm1 = vmor %vm520_vm11, %vm521_vm10 }
 0x9f3   :  { %v517_v0 = vsub.f32 1.0, %v516_v63  ;;  %v1113_v63 = vmov 2  }
 0x9f5   :  { %v518_v1 = vmul.f32 %v969_v62, %v517_v0  ;;  %v1354_v0 = vsel %vm142_vm6, 5, %v1113_v63 }
 0x9f6   :  { %vm157_vm7 = vcmp.gt.s32.totalorder %v1227_v50, %v1354_v0 }
 0x9f7   :  { %v519_v37 = vadd.f32 %v969_v62, %v518_v1 }
 0x9f9   :  { %v523_v36 = vsel %vm522_vm1, %v969_v62, %v519_v37 }
 0x9fa   :  { %v528_v6 = vsel %vm525_vm13, %v527_v3, %v523_v36 }
 0x9fb   :  { %v535_v10 = vmul.f32 %v533_v9, %v528_v6 }
 0xa58   :  { %v538_v5 = vpop.permute.xlu0 %537 }
 0xa59   :  { %v540_v7 = vmul.f32 %v538_v5, %v528_v6 }
 0xa5b   :  { %542 = vrot.lane.b32.xlu2 %v540_v7, %s1104_s4 }
 0xab5   :  { %v543_v11 = vpop.permute.xlu2 %542 }
 0xab6   :  { %v545_v14 = vadd.f32 %v543_v11, %v535_v10 }
 0xab8   :  { %970 = vtanh.f32 %v545_v14  ;;  %558 = vrot.lane.b32.xlu2 %v545_v14, %s1107_s12 }
 0xabe   :  { %v971_v15 = vpop.eup %970 }
 0xabf   :  { %548 = vrot.lane.b32.xlu0 %v971_v15, %s1104_s4 }
 0xb12   :  { %v559_v21 = vpop.permute.xlu2 %558 }
 0xb13   :  { %v561_v22 = vsel %vm155_vm14, %v559_v21, %v481_v49 }
 0xb14   :  { %v611_v24 = vrot.slane %v561_v22, 4 }
 0xb31   :  { %v549_v16 = vpop.permute.xlu0 %548 }
 0xb32   :  { %v551_v17 = vmul.f32 %v549_v16, %v528_v6 }
 0xb34   :  { %553 = vrot.lane.b32.xlu1 %v551_v17, %s1106_s11 }
 0xb3c   :  { %612 = vrot.lane.b32.xlu1 %v611_v24, %s1104_s4 }
 0xba6   :  { %v1340_v25 = vpop.permute.xlu1 %553 }
 0xba7   :  { %v556_v26 = vsel %vm155_vm14, %v1340_v25, %v475_v52 }
 0xba8   :  { %901 = vmatmul.msk.f32.vlgmr.msra.gmra.mxu3 %vm85_vm0, %v556_v26 }
 0xbae   :  { %v613_v53 = vpop.permute.xlu1 %612 }
 0xc2b   :  { %v583_v27 = vpop.f32.mrf.mxu3 }
 0xc2c   :  { %v587_v28 = vrot.slane %v583_v27, 4 }
 0xc2e   :  { %v589_v30 = vadd.f32 %v587_v28, %v509_v56 }
 0xc30   :  { %972 = vtanh.f32 %v589_v30  ;;  %v902_v33 = vmul.f32 -1.442695, %v589_v30 }
 0xc32   :  { %974 = vpow2.f32 %v902_v33 }
 0xc36   :  { %v973_v31 = vpop.eup %972 }
 0xc37   :  { %617 = vrot.lane.b32.xlu0 %v973_v31, %s1104_s4 }
 0xc38   :  { %v975_v34 = vpop.eup %974 }
 0xc39   :  { %v593_v35 = vadd.f32 1.0, %v975_v34 }
 0xc3b   :  { %976 = vrcp.f32 %v593_v35  ;;  %v605_v44 = vand.u32 2147483648, %v593_v35  ;;  %vm599_vm2 = vweird.f32 %v593_v35  ;;  %v603_v45 = vand.u32 2147483647, %v593_v35 }
 0xc3d   :  { %v606_v47 = vor.u32 1.1754944e-38, %v605_v44  ;;  %vm604_vm5 = vcmp.eq.f32.partialorder %v603_v45, 8.507059e+37 }
 0xc41   :  { %v977_v38 = vpop.eup %976 }
 0xc42   :  { %v595_v39 = vmul.f32 %v977_v38, %v593_v35  ;;  %vm600_vm15 = vweird.f32 %v977_v38 }
 0xc43   :  { %vm601_vm4 = vmor %vm599_vm2, %vm600_vm15 }
 0xc44   :  { %v596_v40 = vsub.f32 1.0, %v595_v39  ;;  %v1114_v39 = vmov 1  }
 0xc46   :  { %v597_v41 = vmul.f32 %v977_v38, %v596_v40  ;;  %v158_v40 = vsel %vm142_vm6, 6, %v1114_v39 }
 0xc47   :  { %vm159_vm13 = vcmp.gt.s32.totalorder %v1227_v50, %v158_v40 }
 0xc48   :  { %v598_v43 = vadd.f32 %v977_v38, %v597_v41 }
 0xc4a   :  { %v602_v46 = vsel %vm601_vm4, %v977_v38, %v598_v43 }
 0xc4b   :  { %v607_v49 = vsel %vm604_vm5, %v606_v47, %v602_v46 }
 0xc4c   :  { %v615_v55 = vmul.f32 %v613_v53, %v607_v49 }
 0xca9   :  { %v618_v48 = vpop.permute.xlu0 %617 }
 0xcaa   :  { %v620_v52 = vmul.f32 %v618_v48, %v607_v49 }
 0xcac   :  { %622 = vrot.lane.b32.xlu2 %v620_v52, %s1104_s4 }
 0xd06   :  { %v623_v56 = vpop.permute.xlu2 %622 }
 0xd07   :  { %v625_v57 = vadd.f32 %v623_v56, %v615_v55 }
 0xd09   :  { %978 = vtanh.f32 %v625_v57  ;;  %v639_v58 = vrot.slane %v625_v57, 4 }
 0xd0b   :  { %640 = vrot.lane.b32.xlu2 %v639_v58, %s1107_s12 }
 0xd0f   :  { %v979_v59 = vpop.eup %978 }
 0xd10   :  { %628 = vrot.lane.b32.xlu0 %v979_v59, %s1104_s4 }
 0xd65   :  { %v641_v1 = vpop.permute.xlu2 %640 }
 0xd66   :  { %v643_v37 = vsel %vm157_vm7, %v641_v1, %v561_v22 }
 0xd82   :  { %v629_v60 = vpop.permute.xlu0 %628 }
 0xd83   :  { %v631_v61 = vmul.f32 %v629_v60, %v607_v49 }
 0xd85   :  { %v633_v62 = vrot.slane %v631_v61, 4 }
 0xd87   :  { %634 = vrot.lane.b32.xlu1 %v633_v62, %s1106_s11 }
 0xd8f   :  { %694 = vrot.lane.b32.xlu1 %v643_v37, %s1104_s4 }
 0xdf9   :  { %v1362_v2 = vpop.permute.xlu1 %634 }
 0xdfa   :  { %v637_v19 = vsel %vm157_vm7, %v1362_v2, %v556_v26 }
 0xdfb   :  { %903 = vmatmul.msk.f32.vlgmr.msra.gmra.mxu1 %vm85_vm0, %v637_v19 }
 0xe01   :  { %v695_v28 = vpop.permute.xlu1 %694 }
 0xe78   :  { %v665_v36 = vpop.f32.mrf.mxu1 }
 0xe79   :  { %v672_v3 = vadd.f32 %v1209_v23, %v665_v36 }
 0xe7b   :  { %980 = vtanh.f32 %v672_v3  ;;  %v904_v6 = vmul.f32 -1.442695, %v672_v3  ;;  %v644_v3 = vsel %vm157_vm7, %v1362_v2, 0.0  ;;  %vm850_vm7 = vcmask 654336  }
 0xe7d   :  { %982 = vpow2.f32 %v904_v6  ;;  %v400_v6 = vsel %vm151_vm3, %v1292_v8, 0.0 }
 0xe81   :  { %v981_v5 = vpop.eup %980 }
 0xe82   :  { %699 = vrot.lane.b32.xlu0 %v981_v5, %s1104_s4 }
 0xe83   :  { %v983_v7 = vpop.eup %982 }
 0xe84   :  { %v676_v9 = vadd.f32 1.0, %v983_v7 }
 0xe86   :  { %984 = vrcp.f32 %v676_v9  ;;  %v688_v17 = vand.u32 2147483648, %v676_v9  ;;  %vm682_vm10 = vweird.f32 %v676_v9  ;;  %v686_v18 = vand.u32 2147483647, %v676_v9 }
 0xe88   :  { %v689_v22 = vor.u32 1.1754944e-38, %v688_v17  ;;  %vm687_vm1 = vcmp.eq.f32.partialorder %v686_v18, 8.507059e+37  ;;  %v482_v17 = vsel %vm153_vm9, %v1314_v51, 0.0  ;;  %vm852_vm9 = vcmask 785408  }
 0xe8c   :  { %v985_v10 = vpop.eup %984 }
 0xe8d   :  { %v678_v11 = vmul.f32 %v985_v10, %v676_v9  ;;  %vm683_vm8 = vweird.f32 %v985_v10 }
 0xe8e   :  { %vm684_vm11 = vmor %vm682_vm10, %vm683_vm8  ;;  %vm854_vm8 = vcmask 916480  }
 0xe8f   :  { %v679_v14 = vsub.f32 1.0, %v678_v11 }
 0xe91   :  { %v680_v15 = vmul.f32 %v985_v10, %v679_v14  ;;  %v320_v14 = vsel %vm149_vm12, %v1259_v32, 0.0  ;;  %vm846_vm12 = vcmask 392192  }
 0xe93   :  { %v681_v16 = vadd.f32 %v985_v10, %v680_v15  ;;  %v562_v15 = vsel %vm155_vm14, %v1340_v25, 0.0  ;;  %vm848_vm14 = vcmask 523264  }
 0xe95   :  { %v685_v21 = vsel %vm684_vm11, %v985_v10, %v681_v16  ;;  %v160_v16 = vsel %vm142_vm6, 7, %v1105_v42  ;;  %vm843_vm6 = vcmask 130048  }
 0xe96   :  { %v690_v26 = vsel %vm687_vm1, %v689_v22, %v685_v21  ;;  %vm161_vm3 = vcmp.gt.s32.totalorder %v1227_v50, %v160_v16 }
 0xe97   :  { %v697_v30 = vmul.f32 %v695_v28, %v690_v26 }
 0xef4   :  { %v700_v24 = vpop.permute.xlu0 %699 }
 0xef5   :  { %v702_v27 = vmul.f32 %v700_v24, %v690_v26  ;;  %v856_v24 = vsel %vm843_vm6, %v562_v15, %v482_v17 }
 0xef7   :  { %704 = vrot.lane.b32.xlu2 %v702_v27, %s1104_s4 }
 0xf51   :  { %v705_v31 = vpop.permute.xlu2 %704 }
 0xf52   :  { %v707_v33 = vadd.f32 %v705_v31, %v697_v30 }
 0xf54   :  { %986 = vtanh.f32 %v707_v33  ;;  %720 = vrot.lane.b32.xlu2 %v707_v33, %s1107_s12 }
 0xf5a   :  { %v987_v34 = vpop.eup %986 }
 0xf5b   :  { %710 = vrot.lane.b32.xlu0 %v987_v34, %s1104_s4 }
 0xfae   :  { %v721_v41 = vpop.permute.xlu2 %720 }
 0xfaf   :  { %v723_v43 = vsel %vm159_vm13, %v721_v41, %v643_v37 }
 0xfb0   :  { %v773_v44 = vrot.slane %v723_v43, 4 }
 0xfcd   :  { %v711_v35 = vpop.permute.xlu0 %710 }
 0xfce   :  { %v713_v38 = vmul.f32 %v711_v35, %v690_v26 }
 0xfd0   :  { %715 = vrot.lane.b32.xlu1 %v713_v38, %s1106_s11 }
 0xfd8   :  { %774 = vrot.lane.b32.xlu1 %v773_v44, %s1104_s4 }
0x1042   :  { %v716_v45 = vpop.permute.xlu1 %715 }
0x1043   :  { %v718_v46 = vsel %vm159_vm13, %v716_v45, %v637_v19  ;;  %v724_v5 = vsel %vm159_vm13, %v716_v45, 0.0 }
0x1044   :  { %905 = vmatmul.msk.f32.vlgmr.msra.gmra.mxu2 %vm85_vm0, %v718_v46 }
0x104a   :  { %v775_v7 = vpop.permute.xlu1 %774 }
0x10c7   :  { %v745_v47 = vpop.f32.mrf.mxu2 }
0x10c8   :  { %v749_v48 = vrot.slane %v745_v47, 4 }
0x10ca   :  { %v751_v49 = vadd.f32 %v749_v48, %v1209_v23 }
0x10cc   :  { %988 = vtanh.f32 %v751_v49  ;;  %v906_v53 = vmul.f32 -1.442695, %v751_v49 }
0x10ce   :  { %990 = vpow2.f32 %v906_v53 }
0x10d2   :  { %v989_v52 = vpop.eup %988 }
0x10d3   :  { %779 = vrot.lane.b32.xlu0 %v989_v52, %s1104_s4 }
0x10d4   :  { %v991_v55 = vpop.eup %990 }
0x10d5   :  { %v755_v56 = vadd.f32 1.0, %v991_v55 }
0x10d7   :  { %992 = vrcp.f32 %v755_v56  ;;  %v767_v62 = vand.u32 2147483648, %v755_v56  ;;  %vm761_vm2 = vweird.f32 %v755_v56  ;;  %v765_v63 = vand.u32 2147483647, %v755_v56 }
0x10d9   :  { %v768_v1 = vor.u32 1.1754944e-38, %v767_v62  ;;  %vm766_vm5 = vcmp.eq.f32.partialorder %v765_v63, 8.507059e+37 }
0x10dd   :  { %v993_v57 = vpop.eup %992 }
0x10de   :  { %v757_v58 = vmul.f32 %v993_v57, %v755_v56  ;;  %vm762_vm15 = vweird.f32 %v993_v57 }
0x10df   :  { %vm763_vm4 = vmor %vm761_vm2, %vm762_vm15 }
0x10e0   :  { %v758_v59 = vsub.f32 1.0, %v757_v58 }
0x10e2   :  { %v759_v60 = vmul.f32 %v993_v57, %v758_v59 }
0x10e4   :  { %v760_v61 = vadd.f32 %v993_v57, %v759_v60 }
0x10e6   :  { %v764_v23 = vsel %vm763_vm4, %v993_v57, %v760_v61 }
0x10e7   :  { %v769_v19 = vsel %vm766_vm5, %v768_v1, %v764_v23 }
0x10e8   :  { %v777_v0 = vmul.f32 %v775_v7, %v769_v19 }
0x1145   :  { %v780_v37 = vpop.permute.xlu0 %779 }
0x1146   :  { %v782_v36 = vmul.f32 %v780_v37, %v769_v19 }
0x1148   :  { %784 = vrot.lane.b32.xlu2 %v782_v36, %s1104_s4 }
0x1150   :  { %824 = vrot.lane.b32.xlu2 %v644_v3, %s1104_s4 }
0x1158   :  { %830 = vrot.lane.b32.xlu2 %v724_v5, %s1106_s11 }
0x1160   :  { %809 = vrot.lane.b32.xlu2 %v400_v6, %s1106_s11 }
0x1168   :  { %840 = vrot.lane.b32.xlu2 %v1232_v54, %s1107_s12 }
0x11a2   :  { %v785_v2 = vpop.permute.xlu2 %784 }
0x11a3   :  { %v787_v9 = vadd.f32 %v785_v2, %v777_v0 }
0x11a5   :  { %994 = vtanh.f32 %v787_v9 }
0x11aa   :  { %v825_v20 = vpop.permute.xlu2 %824 }
0x11ab   :  { %v995_v10 = vpop.eup %994  ;;  %v857_v26 = vsel %vm85_vm0, %v856_v24, %v825_v20 }
0x11ac   :  { %790 = vrot.lane.b32.xlu0 %v995_v10, %s1104_s4 }
0x11b2   :  { %v831_v21 = vpop.permute.xlu2 %830 }
0x11b4   :  { %827 = vrot.lane.b32.xlu0 %v400_v6, %s1104_s4 }
0x11ba   :  { %v810_v42 = vpop.permute.xlu2 %809 }
0x11bc   :  { %805 = vrot.lane.b32.xlu0 %v724_v5, %s1104_s4 }
0x11c2   :  { %v841_v35 = vpop.permute.xlu2 %840 }
0x121e   :  { %v791_v11 = vpop.permute.xlu0 %790 }
0x121f   :  { %v793_v4 = vmul.f32 %v791_v11, %v769_v19 }
0x1221   :  { %v795_v8 = vrot.slane %v793_v4, 4 }
0x1223   :  { %796 = vrot.lane.b32.xlu1 %v795_v8, %s1106_s11 }
0x1226   :  { %v828_v18 = vpop.permute.xlu0 %827 }
0x1227   :  { %v858_v27 = vsel %vm846_vm12, %v857_v26, %v828_v18 }
0x1228   :  { %v859_v30 = vsel %vm848_vm14, %v858_v27, %v831_v21 }
0x122b   :  { %801 = vrot.lane.b32.xlu1 %v320_v14, %s1104_s4 }
0x122e   :  { %v806_v13 = vpop.permute.xlu0 %805 }
0x1233   :  { %833 = vrot.lane.b32.xlu1 %v320_v14, %s1106_s11 }
0x123b   :  { %813 = vrot.lane.b32.xlu1 %v644_v3, %s1106_s11 }
0x1243   :  { %821 = vrot.lane.b32.xlu1 %v562_v15, %s1107_s12 }
0x1295   :  { %v797_v29 = vpop.permute.xlu1 %796 }
0x1296   :  { %v799_v32 = vsel %vm161_vm3, %v797_v29, 0.0 }
0x1297   :  { %837 = vrot.lane.b32.xlu0 %v799_v32, %s1107_s12  ;;  %v844_v50 = vsel %vm843_vm6, %v1232_v54, %v799_v32 }
0x129d   :  { %v802_v25 = vpop.permute.xlu1 %801 }
0x129e   :  { %v845_v51 = vsel %vm85_vm0, %v844_v50, %v802_v25  ;;  %vm866_vm0 = vcmask 1043456  }
0x129f   :  { %817 = vrot.lane.b32.xlu0 %v482_v17, %s1107_s12  ;;  %v847_v34 = vsel %vm846_vm12, %v845_v51, %v806_v13 }
0x12a0   :  { %v849_v39 = vsel %vm848_vm14, %v847_v34, %v810_v42 }
0x12a5   :  { %v834_v22 = vpop.permute.xlu1 %833 }
0x12a6   :  { %v860_v31 = vsel %vm850_vm7, %v859_v30, %v834_v22 }
0x12ad   :  { %v814_v28 = vpop.permute.xlu1 %813 }
0x12ae   :  { %v851_v54 = vsel %vm850_vm7, %v849_v39, %v814_v28 }
0x12b5   :  { %v822_v41 = vpop.permute.xlu1 %821 }
0x1309   :  { %v838_v12 = vpop.permute.xlu0 %837 }
0x130a   :  { %v861_v33 = vsel %vm852_vm9, %v860_v31, %v838_v12 }
0x130b   :  { %v862_v38 = vsel %vm854_vm8, %v861_v33, %v841_v35 }
0x130c   :  { %v865_v43 = vrot.slane %v862_v38, 4 }
0x1311   :  { %v818_v40 = vpop.permute.xlu0 %817 }
0x1312   :  { %v853_v44 = vsel %vm852_vm9, %v851_v54, %v818_v40 }
0x1313   :  { %v855_v45 = vsel %vm854_vm8, %v853_v44, %v822_v41 }
0x1314   :  { %v867_v46 = vsel %vm866_vm0, %v855_v45, %v865_v43 }
0x1315   :  { %869 = vst [vmem:[#allocation8] sm:$0xff] %v867_v46 }
0x1316   :  { %880 = dma.vmem_to_hbm [thread:$0]  %s876_s13, 128, %s878_s16, [#allocation4]  }
0x1317   :  { %1096 = dma.done.wait [#allocation4], 128  }
0x1318   :  { %1097 = vsyncadd [#allocation4], 4294967168 }
0x1319   :  { %885 = vsyncpa [#allocation3], 1 }
0x131a   :  { %886 = vsyncpa [#allocation6], 1 }
0x131b   :  { %887 = vsyncpa [#allocation4], 1 }

</bundles_post_ra>
